<compile_context>
chip_gen: v7x
topology: tpu7x:2x2x1
jax: 0.10.0
libtpu: 0.0.40
codegen_flags: <defaults>
</compile_context>

<pallas_src>
import jax
import jax.numpy as jnp
from jax.experimental import pallas as pl
from jax.experimental.pallas import tpu as pltpu

K_IN = 28 * 28       # 784
K_PAD = 896          # 784 padded up to 7 * 128 lanes
H = 512
OUT_PAD = 128        # 10 logits padded up to one full 128-lane group
N_OUT = 10


def mlp_kernel(x_ref, w1_ref, b1_ref, w2_ref, b2_ref, w3_ref, b3_ref, o_ref):
    # x tile: (TILE_B, 896) bf16; weights bf16; biases f32; output f32 (TILE_B, 128)
    x = x_ref[...]

    # Linear(784 -> 512) + ReLU   (bf16 operands, f32 accumulate, f32 elementwise)
    h1 = jnp.dot(x, w1_ref[...], preferred_element_type=jnp.float32)
    h1 = jnp.maximum(h1 + b1_ref[...], 0.0)

    # Linear(512 -> 512) + ReLU
    h2 = jnp.dot(h1.astype(jnp.bfloat16), w2_ref[...],
                 preferred_element_type=jnp.float32)
    h2 = jnp.maximum(h2 + b2_ref[...], 0.0)

    # Linear(512 -> 10), lane-padded to 128 output columns (padded cols are exact zeros)
    logits = jnp.dot(h2.astype(jnp.bfloat16), w3_ref[...],
                     preferred_element_type=jnp.float32)
    o_ref[...] = logits + b3_ref[...]


def _round_up(n, m):
    return ((n + m - 1) // m) * m


def _choose_tiling(B, max_tile):
    """Return (TILE_B, B_pad, n_tiles).

    - rows aligned to 16 (bf16 native (16,128) sublane tiling, avoids relayouts)
    - >= 2 grid tiles whenever the batch allows it (both v7x TensorCores get work)
    - large batches: pick the tile in {128,256,512,1024} minimizing batch padding,
      preferring an even tile count, then the biggest tile.
    """
    B_aligned = _round_up(B, 16)
    if B_aligned <= max_tile:
        if B_aligned >= 32:
            tile = _round_up((B_aligned + 1) // 2, 16)   # two roughly-equal tiles
            return tile, 2 * tile, 2
        return B_aligned, B_aligned, 1                   # tiny batch: one tile
    candidates = [t for t in (128, 256, 512, 1024) if t <= max_tile] or [max_tile]

    def cost(t):
        b_pad = _round_up(B_aligned, t)
        n = b_pad // t
        return (b_pad - B, n % 2, -t)   # least padding, then even #tiles, then biggest

    tile = min(candidates, key=cost)
    b_pad = _round_up(B_aligned, tile)
    return tile, b_pad, b_pad // tile


def prepare_params(params):
    """Pad + cast the f32 (in, out) params into the kernel's layout."""
    w1 = jnp.zeros((K_PAD, H), jnp.float32).at[:K_IN, :].set(params["w1"])
    w3 = jnp.zeros((H, OUT_PAD), jnp.float32).at[:, :N_OUT].set(params["w3"])
    b3 = jnp.zeros((1, OUT_PAD), jnp.float32).at[:, :N_OUT].set(params["b3"])
    return {
        "w1": w1.astype(jnp.bfloat16),
        "b1": params["b1"].astype(jnp.float32),
        "w2": params["w2"].astype(jnp.bfloat16),
        "b2": params["b2"].astype(jnp.float32),
        "w3": w3.astype(jnp.bfloat16),
        "b3": b3,
    }


def net_forward(x_nchw, kparams, *, tile_b=512):
    """Forward pass matching the PyTorch Net module.

    x_nchw:  (B, 1, 28, 28) float32
    kparams: output of prepare_params()
    returns: (B, 10) float32 logits
    """
    B = x_nchw.shape[0]
    TILE_B, B_pad, n_tiles = _choose_tiling(B, tile_b)

    # Fused staging: cast to bf16 first, THEN zero-pad rows/K -> only bf16 bytes move.
    x_flat = x_nchw.reshape(B, K_IN).astype(jnp.bfloat16)
    x_padded = jnp.pad(x_flat, ((0, B_pad - B), (0, K_PAD - K_IN)))

    # Weights/biases: constant index_map (DMA'd once, VMEM-resident) and single-buffered
    # (they never revolve, so a second pipeline buffer is pure VMEM waste).
    const = lambda shape: pl.BlockSpec(
        shape, lambda i: (0, 0), pipeline_mode=pl.Buffered(1))

    flops = 2 * B_pad * (K_PAD * H + H * H + H * OUT_PAD)
    bytes_accessed = (
        B_pad * K_PAD * 2                              # x (bf16)
        + (K_PAD * H + H * H + H * OUT_PAD) * 2        # weights (bf16)
        + (H + H + OUT_PAD) * 4                        # biases (f32)
        + B_pad * OUT_PAD * 4                          # logits out (f32)
    )

    out_padded = pl.pallas_call(
        mlp_kernel,
        out_shape=jax.ShapeDtypeStruct((B_pad, OUT_PAD), jnp.float32),
        grid=(n_tiles,),
        in_specs=[
            pl.BlockSpec((TILE_B, K_PAD), lambda i: (i, 0)),   # x tiles pipeline
            const((K_PAD, H)),                                 # w1
            const((1, H)),                                     # b1
            const((H, H)),                                     # w2
            const((1, H)),                                     # b2
            const((H, OUT_PAD)),                               # w3 (lane-padded)
            const((1, OUT_PAD)),                               # b3
        ],
        out_specs=pl.BlockSpec((TILE_B, OUT_PAD), lambda i: (i, 0)),
        compiler_params=pltpu.CompilerParams(
            dimension_semantics=("parallel",),     # batch tiles split across TCs on v7x
            vmem_limit_bytes=32 * 1024 * 1024,     # headroom incl. v5e's 16 MiB default
        ),
        cost_estimate=pl.CostEstimate(
            flops=flops, transcendentals=0, bytes_accessed=bytes_accessed),
    )(
        x_padded,
        kparams["w1"], kparams["b1"],
        kparams["w2"], kparams["b2"],
        kparams["w3"], kparams["b3"],
    )

    return out_padded[:B, :N_OUT]


def init_params(key):
    """Deterministic init mimicking torch.nn.Linear's U(-1/sqrt(fan_in), 1/sqrt(fan_in)).

    Weights stored as (in, out) so the kernel computes x @ W (== PyTorch x @ W_t.T)."""
    dims = [(K_IN, H), (H, H), (H, N_OUT)]
    params = {}
    for i, (fan_in, fan_out) in enumerate(dims, start=1):
        key, kw, kb = jax.random.split(key, 3)
        bound = 1.0 / jnp.sqrt(jnp.float32(fan_in))
        params[f"w{i}"] = jax.random.uniform(
            kw, (fan_in, fan_out), jnp.float32, minval=-bound, maxval=bound
        )
        params[f"b{i}"] = jax.random.uniform(
            kb, (1, fan_out), jnp.float32, minval=-bound, maxval=bound
        )
    return params


def reference_forward_f32(x_nchw, params):
    """Plain-JAX f32 reference (exact PyTorch semantics)."""
    x = x_nchw.reshape(x_nchw.shape[0], -1)
    h1 = jnp.maximum(x @ params["w1"] + params["b1"], 0.0)
    h2 = jnp.maximum(h1 @ params["w2"] + params["b2"], 0.0)
    return h2 @ params["w3"] + params["b3"]


def reference_forward_bf16(x_nchw, params):
    """Plain-JAX reference with the same bf16-operand / f32-accumulate math as the kernel."""
    x = x_nchw.reshape(x_nchw.shape[0], -1).astype(jnp.bfloat16)
    h1 = jnp.dot(x, params["w1"].astype(jnp.bfloat16),
                 preferred_element_type=jnp.float32)
    h1 = jnp.maximum(h1 + params["b1"], 0.0)
    h2 = jnp.dot(h1.astype(jnp.bfloat16), params["w2"].astype(jnp.bfloat16),
                 preferred_element_type=jnp.float32)
    h2 = jnp.maximum(h2 + params["b2"], 0.0)
    out = jnp.dot(h2.astype(jnp.bfloat16), params["w3"].astype(jnp.bfloat16),
                  preferred_element_type=jnp.float32)
    return out + params["b3"]


if __name__ == "__main__":
    key = jax.random.PRNGKey(0)
    key, kx = jax.random.split(key)

    # Small FashionMNIST-shaped batch (NCHW). B=40 exercises the multi-tile path:
    # rows align to 48, split into two 32-row tiles (grid=(2,), both TCs busy on v7x),
    # padded rows/cols are exact zeros and sliced off below.
    B = 40
    x = jax.random.normal(kx, (B, 1, 28, 28), jnp.float32)

    params = init_params(key)
    kparams = prepare_params(params)

    logits = net_forward(x, kparams)
    logits = jax.block_until_ready(logits)
    assert logits.shape == (B, N_OUT)

    # Tight check against a reference using the same bf16-operand math.
    ref_bf16 = reference_forward_bf16(x, params)
    assert jnp.allclose(logits, ref_bf16, atol=5e-3, rtol=5e-3), \
        "mismatch vs bf16-matched reference"

    # Loose check against the exact f32 PyTorch-semantics reference.
    ref_f32 = reference_forward_f32(x, params)
    assert jnp.allclose(logits, ref_f32, atol=5e-2, rtol=5e-2), \
        "mismatch vs f32 reference"

    print("KERNEL_OK")
</pallas_src>

<mosaic_0001>
module attributes {stable_mosaic.version = 11 : i64} {
  func.func @mlp_kernel(%arg0: i32, %arg1: memref<32x896xbf16, #tpu.memory_space<vmem>>, %arg2: memref<896x512xbf16, #tpu.memory_space<vmem>>, %arg3: memref<1x512xf32, #tpu.memory_space<vmem>>, %arg4: memref<512x512xbf16, #tpu.memory_space<vmem>>, %arg5: memref<1x512xf32, #tpu.memory_space<vmem>>, %arg6: memref<512x128xbf16, #tpu.memory_space<vmem>>, %arg7: memref<1x128xf32, #tpu.memory_space<vmem>>, %arg8: memref<32x128xf32, #tpu.memory_space<vmem>>) attributes {dimension_semantics = [#tpu.dimension_semantics<parallel>], iteration_bounds = array<i64: 2>, scalar_prefetch = 0 : i64, scratch_operands = 0 : i64, tpu.core_type = #tpu.core_type<tc>, window_params = [{transform_indices = @transform_0, window_bounds = array<i64: 32, 896>}, {pipeline_mode = #tpu.pipeline_mode<synchronous>, transform_indices = @transform_1, window_bounds = array<i64: 896, 512>}, {pipeline_mode = #tpu.pipeline_mode<synchronous>, transform_indices = @transform_2, window_bounds = array<i64: 1, 512>}, {pipeline_mode = #tpu.pipeline_mode<synchronous>, transform_indices = @transform_3, window_bounds = array<i64: 512, 512>}, {pipeline_mode = #tpu.pipeline_mode<synchronous>, transform_indices = @transform_4, window_bounds = array<i64: 1, 512>}, {pipeline_mode = #tpu.pipeline_mode<synchronous>, transform_indices = @transform_5, window_bounds = array<i64: 512, 128>}, {pipeline_mode = #tpu.pipeline_mode<synchronous>, transform_indices = @transform_6, window_bounds = array<i64: 1, 128>}, {transform_indices = @transform_7, window_bounds = array<i64: 32, 128>}]} {
    %c0 = arith.constant 0 : index
    %c0_0 = arith.constant 0 : index
    %0 = vector.load %arg1[%c0, %c0_0] : memref<32x896xbf16, #tpu.memory_space<vmem>>, vector<32x896xbf16>
    %c0_1 = arith.constant 0 : index
    %c0_2 = arith.constant 0 : index
    %1 = vector.load %arg2[%c0_1, %c0_2] : memref<896x512xbf16, #tpu.memory_space<vmem>>, vector<896x512xbf16>
    %cst = arith.constant dense<0.000000e+00> : vector<32x512xf32>
    %2 = tpu.matmul %0, %1, %cst {dimension_numbers = #tpu.dot_dimension_numbers<[1], [0], [0], [1], [0, 0, 1, 1], [], []>} : vector<32x896xbf16>, vector<896x512xbf16>, vector<32x512xf32> -> vector<32x512xf32>
    %c0_3 = arith.constant 0 : index
    %c0_4 = arith.constant 0 : index
    %3 = vector.load %arg3[%c0_3, %c0_4] : memref<1x512xf32, #tpu.memory_space<vmem>>, vector<1x512xf32>
    %4 = vector.broadcast %3 : vector<1x512xf32> to vector<32x512xf32>
    %5 = arith.addf %2, %4 : vector<32x512xf32>
    %cst_5 = arith.constant 0.000000e+00 : f32
    %6 = vector.broadcast %cst_5 : f32 to vector<32x512xf32>
    %7 = arith.maximumf %5, %6 : vector<32x512xf32>
    %8 = arith.truncf %7 : vector<32x512xf32> to vector<32x512xbf16>
    %c0_6 = arith.constant 0 : index
    %c0_7 = arith.constant 0 : index
    %9 = vector.load %arg4[%c0_6, %c0_7] : memref<512x512xbf16, #tpu.memory_space<vmem>>, vector<512x512xbf16>
    %cst_8 = arith.constant dense<0.000000e+00> : vector<32x512xf32>
    %10 = tpu.matmul %8, %9, %cst_8 {dimension_numbers = #tpu.dot_dimension_numbers<[1], [0], [0], [1], [0, 0, 1, 1], [], []>} : vector<32x512xbf16>, vector<512x512xbf16>, vector<32x512xf32> -> vector<32x512xf32>
    %c0_9 = arith.constant 0 : index
    %c0_10 = arith.constant 0 : index
    %11 = vector.load %arg5[%c0_9, %c0_10] : memref<1x512xf32, #tpu.memory_space<vmem>>, vector<1x512xf32>
    %12 = vector.broadcast %11 : vector<1x512xf32> to vector<32x512xf32>
    %13 = arith.addf %10, %12 : vector<32x512xf32>
    %cst_11 = arith.constant 0.000000e+00 : f32
    %14 = vector.broadcast %cst_11 : f32 to vector<32x512xf32>
    %15 = arith.maximumf %13, %14 : vector<32x512xf32>
    %16 = arith.truncf %15 : vector<32x512xf32> to vector<32x512xbf16>
    %c0_12 = arith.constant 0 : index
    %c0_13 = arith.constant 0 : index
    %17 = vector.load %arg6[%c0_12, %c0_13] : memref<512x128xbf16, #tpu.memory_space<vmem>>, vector<512x128xbf16>
    %cst_14 = arith.constant dense<0.000000e+00> : vector<32x128xf32>
    %18 = tpu.matmul %16, %17, %cst_14 {dimension_numbers = #tpu.dot_dimension_numbers<[1], [0], [0], [1], [0, 0, 1, 1], [], []>} : vector<32x512xbf16>, vector<512x128xbf16>, vector<32x128xf32> -> vector<32x128xf32>
    %c0_15 = arith.constant 0 : index
    %c0_16 = arith.constant 0 : index
    %19 = vector.load %arg7[%c0_15, %c0_16] : memref<1x128xf32, #tpu.memory_space<vmem>>, vector<1x128xf32>
    %20 = vector.broadcast %19 : vector<1x128xf32> to vector<32x128xf32>
    %21 = arith.addf %18, %20 : vector<32x128xf32>
    %c0_17 = arith.constant 0 : index
    %c0_18 = arith.constant 0 : index
    %22 = vector.load %arg8[%c0_17, %c0_18] : memref<32x128xf32, #tpu.memory_space<vmem>>, vector<32x128xf32>
    tpu.vector_store %arg8[%c0_17, %c0_18], %21 {strides = array<i32>} : memref<32x128xf32, #tpu.memory_space<vmem>>, vector<32x128xf32>,
    return
  }
  func.func @transform_0(%arg0: i32) -> (i32, i32) {
    %c0_i32 = arith.constant 0 : i32
    %c0_i32_0 = arith.constant 0 : i32
    return %arg0, %c0_i32 : i32, i32
  }
  func.func @transform_1(%arg0: i32) -> (i32, i32) {
    %c0_i32 = arith.constant 0 : i32
    %c0_i32_0 = arith.constant 0 : i32
    %c0_i32_1 = arith.constant 0 : i32
    return %c0_i32, %c0_i32_0 : i32, i32
  }
  func.func @transform_2(%arg0: i32) -> (i32, i32) {
    %c0_i32 = arith.constant 0 : i32
    %c0_i32_0 = arith.constant 0 : i32
    %c0_i32_1 = arith.constant 0 : i32
    return %c0_i32, %c0_i32_0 : i32, i32
  }
  func.func @transform_3(%arg0: i32) -> (i32, i32) {
    %c0_i32 = arith.constant 0 : i32
    %c0_i32_0 = arith.constant 0 : i32
    %c0_i32_1 = arith.constant 0 : i32
    return %c0_i32, %c0_i32_0 : i32, i32
  }
  func.func @transform_4(%arg0: i32) -> (i32, i32) {
    %c0_i32 = arith.constant 0 : i32
    %c0_i32_0 = arith.constant 0 : i32
    %c0_i32_1 = arith.constant 0 : i32
    return %c0_i32, %c0_i32_0 : i32, i32
  }
  func.func @transform_5(%arg0: i32) -> (i32, i32) {
    %c0_i32 = arith.constant 0 : i32
    %c0_i32_0 = arith.constant 0 : i32
    %c0_i32_1 = arith.constant 0 : i32
    return %c0_i32, %c0_i32_0 : i32, i32
  }
  func.func @transform_6(%arg0: i32) -> (i32, i32) {
    %c0_i32 = arith.constant 0 : i32
    %c0_i32_0 = arith.constant 0 : i32
    %c0_i32_1 = arith.constant 0 : i32
    return %c0_i32, %c0_i32_0 : i32, i32
  }
  func.func @transform_7(%arg0: i32) -> (i32, i32) {
    %c0_i32 = arith.constant 0 : i32
    %c0_i32_0 = arith.constant 0 : i32
    return %arg0, %c0_i32 : i32, i32
  }
}

</mosaic_0001>

<bundles_post_ra>
// kernel: tpu_custom_call.1
= control target key start
LH: loop header
LB: loop body
LE: loop exit
PB: predicated region body
PF: predicated region fallthrough
CT: control target
= control target key end

     0   :  { %12 = vsyncpa [#allocation3], 0  ;;  %s5557_s0 = inlined_call_operand.hbm [shape: bf16[64,896], index: 0, kind: input, shape index: {}]   ;;  %s5558_s1 = inlined_call_operand.hbm [shape: bf16[896,512], index: 1, kind: input, shape index: {}]   ;;  %s5559_s2 = inlined_call_operand.vmem [shape: f32[1,512], index: 2, kind: input, shape index: {}]   ;;  %s5560_s3 = inlined_call_operand.hbm [shape: bf16[512,512], index: 3, kind: input, shape index: {}]   ;;  %s5561_s4 = inlined_call_operand.vmem [shape: f32[1,512], index: 4, kind: input, shape index: {}]   ;;  %s5562_s5 = inlined_call_operand.hbm [shape: bf16[512,128], index: 5, kind: input, shape index: {}]   ;;  %s5563_s6 = inlined_call_operand.vmem [shape: f32[1,128], index: 6, kind: input, shape index: {}]   ;;  %s5564_s7 = inlined_call_operand.hbm [shape: f32[64,128], index: 7, kind: output, shape index: {}]  }
   0x1   :  { %14 = vsyncpa [#allocation3 + $0x1], 0 }
   0x2   :  { %15 = vsyncpa [#allocation6], 0 }
   0x3   :  { %16 = vsyncpa [#allocation9], 0 }
   0x4   :  { %17 = vsyncpa [#allocation4], 0 }
   0x5   :  { %19 = vsyncpa [#allocation4 + $0x1], 0  ;;  %s5238_s24 = smov 0   ;;  %s5240_s25 = smov 0  }
   0x6   :  { %s5242_s26 = smov 0   ;;  %s5244_s27 = smov 0  }
   0x7 LB: > { %s5259_s28 = sadd.s32 4294967295, %s5182_s27   ;;  %s3754_s29 = sadd.s32 4294967294, %s5182_s27   ;;  %s5182_s27 = sphi %s5244_s27, %s5590_s27   ;;  %s5178_s26 = sphi %s5242_s26, %s5589_s26   ;;  %s5174_s25 = sphi %s5240_s25, %s5588_s25   ;;  %s5170_s24 = sphi %s5238_s24, %s5587_s24  }
   0x8   : > { %p45_p0 = scmp.ne.s32.totalorder %s5174_s25, %s5170_s24  ;;  %p5565_p1 = scmp.eq.s32.totalorder %s5259_s28, 0 }
   0x9   : > { %p201_p3 = scmp.eq.s32.totalorder %s3754_s29, 1  ;;  %p3755_p5 = scmp.ge.s32.totalorder %s5182_s27, 1 }
   0xa   : > { %p5268_p4 = por %p5565_p1, %p45_p0  ;;  %p208_p7 = scmp.lt.s32.totalorder %s5182_s27, 3 }
   0xb   : > { %p5273_p6 = por %p201_p3, %p45_p0  ;;  %s5184_s10 = smov [#allocation5]  }
   0xc   : > { %s5569_s30 = scalar_select %p5268_p4, 1, 0 }
   0xd   : > { %s5570_s8 = scalar_select %p5273_p6, 1, 0 }
   0xe   : > { %p5278_p8 = pnand %p3755_p5, %p208_p7  ;;  %s220_s11 = sshll.u32 %s5184_s10, 4  ;;  %s5282_s11 = int_to_ptr.vmem [resolvable:$true] %s220_s11 }
   0xf   : > { %5571 = sst [smem:[#allocation15_spill]] %s5570_s8  ;;  %s5185_s13 = smov [#allocation7]  }
  0x10   : > { %s5572_s9 = scalar_select %p5278_p8, 1, 0 }
  0x11   : > { %p4344_p9 = pneg %p5278_p8  ;;  %s236_s14 = sshll.u32 %s5185_s13, 4  ;;  %s5293_s14 = int_to_ptr.vmem [resolvable:$true] %s236_s14 }
  0x12   : > { %s5186_s15 = smov [#allocation8]   ;;  %s4994_s19 = scalar_lea.hbm %s5558_s1, 28672 }
  0x13   : > { %p5289_p11 = pnand %p4344_p9, %p5565_p1  ;;  %s5295_s16 = sshll.u32 %s5186_s15, 4  ;;  %s253_s16 = int_to_ptr.vmem [resolvable:$true] %s5295_s16 }
  0x14   : > { %p4995_p12 = scmp.ne.s32.totalorder %s5558_s1, %s4994_s19  ;;  %p5001_p5 = scmp.lt.u32.totalorder %s4994_s19, %s5558_s1 }
  0x15   : > { %p5305_p13 = pneg %p5289_p11 }
  0x17   : > { %p4997_p0 = pnand %p5305_p13, %p4995_p12 }
  0x19   : > { %p4998_p3 = pneg %p4997_p0 }
  0x1b   : > { %p5003_p7 = pnand %p5001_p5, %p4998_p3 }
  0x1d   : > { %5006 = shalt.err (!%p5003_p7)
}
  0x1e   : > { %s5007_s10 = scalar_lea.vmem %s5282_s11, 28672  ;;  %p5015_p2 = scmp.lt.s32.totalorder %s5282_s11, %s5282_s11 }
  0x1f   : > { %p5008_p9 = scmp.ne.s32.totalorder %s5282_s11, %s5007_s10  ;;  %p5016_p6 = scmp.lt.s32.totalorder %s5007_s10, %s5007_s10 }
  0x21   : > { %p5010_p10 = pnand %p5008_p9, %p5305_p13  ;;  %p5017_p12 = por %p5016_p6, %p5015_p2 }
  0x23   : > { %p5011_p1 = pneg %p5010_p10 }
  0x25   : > { %p5018_p0 = pnand %p5017_p12, %p5011_p1 }
  0x27   : > { %5021 = shalt.err (!%p5018_p0)
}
  0x28   : > { %s5187_s13 = smov 256   ;;  %s5188_s15 = smov 16  }
  0x29   : > { %4347 = dma.hbm_to_vmem [thread:$0]  (!%p5289_p11), %s5558_s1, 28672, %s5282_s11, [#allocation6], %s5187_s13, %s5187_s13, %s5188_s15  }
  0x2a   : > { %s5022_s21 = scalar_lea.hbm %s5560_s3, 16384 }
  0x2b   : > { %p5023_p2 = scmp.ne.s32.totalorder %s5560_s3, %s5022_s21  ;;  %p5029_p10 = scmp.lt.u32.totalorder %s5022_s21, %s5560_s3 }
  0x2d   : > { %p5025_p1 = pnand %p5023_p2, %p5305_p13 }
  0x2f   : > { %p5026_p6 = pneg %p5025_p1 }
  0x31   : > { %p5031_p3 = pnand %p5029_p10, %p5026_p6 }
  0x33   : > { %5034 = shalt.err (!%p5031_p3)
}
  0x34   : > { %s5035_s11 = scalar_lea.vmem %s5293_s14, 16384  ;;  %p5043_p12 = scmp.lt.s32.totalorder %s5293_s14, %s5293_s14 }
  0x35   : > { %p5036_p5 = scmp.ne.s32.totalorder %s5293_s14, %s5035_s11  ;;  %p5044_p0 = scmp.lt.s32.totalorder %s5035_s11, %s5035_s11 }
  0x37   : > { %p5038_p7 = pnand %p5036_p5, %p5305_p13  ;;  %p5045_p2 = por %p5044_p0, %p5043_p12 }
  0x39   : > { %p5039_p9 = pneg %p5038_p7 }
  0x3b   : > { %p5046_p1 = pnand %p5045_p2, %p5039_p9 }
  0x3d   : > { %5049 = shalt.err (!%p5046_p1)
}
  0x3e   : > { %4350 = dma.hbm_to_vmem [thread:$0]  (!%p5289_p11), %s5560_s3, 16384, %s5293_s14, [#allocation6], %s5187_s13, %s5187_s13, %s5188_s15  }
  0x3f   : > { %s5050_s20 = scalar_lea.hbm %s5562_s5, 4096 }
  0x40   : > { %p5051_p6 = scmp.ne.s32.totalorder %s5562_s5, %s5050_s20  ;;  %p5057_p5 = scmp.lt.u32.totalorder %s5050_s20, %s5562_s5 }
  0x42   : > { %p5053_p10 = pnand %p5051_p6, %p5305_p13 }
  0x44   : > { %p5054_p3 = pneg %p5053_p10 }
  0x46   : > { %p5059_p7 = pnand %p5057_p5, %p5054_p3 }
  0x48   : > { %5062 = shalt.err (!%p5059_p7)
}
  0x49   : > { %s5063_s11 = scalar_lea.vmem %s253_s16, 4096  ;;  %p5071_p2 = scmp.lt.s32.totalorder %s253_s16, %s253_s16 }
  0x4a   : > { %p5064_p9 = scmp.ne.s32.totalorder %s253_s16, %s5063_s11  ;;  %p5072_p1 = scmp.lt.s32.totalorder %s5063_s11, %s5063_s11 }
  0x4c   : > { %p5066_p12 = pnand %p5064_p9, %p5305_p13  ;;  %p5073_p4 = por %p5072_p1, %p5071_p2 }
  0x4e   : > { %p5067_p0 = pneg %p5066_p12 }
  0x50   : > { %p5074_p8 = pnand %p5073_p4, %p5067_p0 }
  0x52   : > { %5077 = shalt.err (!%p5074_p8)
}
  0x53   : > { %s5189_s14 = smov 64   ;;  %s5190_s22 = smov 4  }
  0x54   : > { %4353 = dma.hbm_to_vmem [thread:$0]  (!%p5289_p11), %s5562_s5, 4096, %s253_s16, [#allocation9], %s5189_s14, %s5189_s14, %s5190_s22  }
  0x55   : > { %s5369_s8 = sadd.s32 1, %s5182_s27   ;;  %s32_s18 = sadd.s32 1, %s5178_s26 }
  0x56   : > { %s29_s17 = ssub.s32 %s5182_s27, %s5369_s8  ;;  %p39_p8 = scmp.ne.s32.totalorder %s5178_s26, %s5174_s25 }
  0x57   : > { %p30_p4 = scmp.eq.s32.totalorder %s29_s17, 0  ;;  %p40_p13 = scmp.eq.s32.totalorder %s5182_s27, 0 }
  0x58   : > { %p4365_p6 = scmp.lt.s32.totalorder %s5182_s27, 2  ;;  %p5575_p3 = scmp.eq.s32.totalorder %s5259_s28, 1 }
  0x59   : > { %s5379_s19 = scalar_select %p30_p4, %s5178_s26, %s32_s18  }
  0x5a   : > { %p41_p10 = por %p40_p13, %p39_p8  ;;  %p5383_p5 = por %p5575_p3, %p39_p8 }
  0x5b   : > { %s269_s12 = sand.u32 1, %s5178_s26   ;;  %s4326_s21 = smul.u32 1792, %s5182_s27 }
  0x5c   : > { %s4325_s16 = smul.u32 112, %s269_s12  ;;  %p5394_p11 = pnand %p4365_p6, %p41_p10 }
  0x5d   : > { %s5392_s10 = scalar_lea.hbm %s5557_s0, %s4326_s21  ;;  %s5400_s13 = scalar_lea.sflag [#allocation3], %s269_s12 }
  0x5e   : > { %s273_s14 = scalar_lea.vmem [#allocation2], %s4325_s16  ;;  %s5078_s15 = scalar_lea.hbm %s5392_s10, 1792 }
  0x5f   : > { %s281_s22 = sshll.u32 %s273_s14, 4  ;;  %p5079_p7 = scmp.ne.s32.totalorder %s5392_s10, %s5078_s15  ;;  %s5398_s22 = int_to_ptr.vmem [resolvable:$true] %s281_s22 }
  0x60   : > { %p5080_p9 = pneg %p5394_p11  ;;  %s5083_s21 = scalar_lea.hbm %s5557_s0, 3584 }
  0x61   : > { %p5084_p2 = scmp.lt.u32.totalorder %s5392_s10, %s5557_s0  ;;  %p5085_p1 = scmp.lt.u32.totalorder %s5083_s21, %s5078_s15 }
  0x62   : > { %p5081_p12 = pnand %p5080_p9, %p5079_p7  ;;  %p5087_p8 = scmp.lt.u32.totalorder %s5078_s15, %s5392_s10 }
  0x63   : > { %p5086_p4 = por %p5085_p1, %p5084_p2 }
  0x64   : > { %p5082_p0 = pneg %p5081_p12 }
  0x65   : > { %p5088_p13 = por %p5087_p8, %p5086_p4 }
  0x67   : > { %p5089_p6 = pnand %p5088_p13, %p5082_p0 }
  0x69   : > { %5092 = shalt.err (!%p5089_p6)
}
  0x6a   : > { %s5093_s12 = scalar_lea.vmem %s5398_s22, 1792  ;;  %s5191_s16 = smov [#allocation2]  }
  0x6b   : > { %p5094_p10 = scmp.ne.s32.totalorder %s5398_s22, %s5093_s12  ;;  %s5098_s14 = sshll.u32 %s5191_s16, 4  ;;  %s5099_s14 = int_to_ptr.vmem [resolvable:$false] %s5098_s14 }
  0x6c   : > { %s5100_s17 = scalar_lea.vmem %s5099_s14, 3584  ;;  %p5101_p12 = scmp.lt.s32.totalorder %s5398_s22, %s5099_s14 }
  0x6d   : > { %p5096_p3 = pnand %p5094_p10, %p5080_p9  ;;  %p5102_p2 = scmp.lt.s32.totalorder %s5100_s17, %s5093_s12 }
  0x6f   : > { %p5097_p7 = pneg %p5096_p3  ;;  %p5103_p1 = por %p5102_p2, %p5101_p12 }
  0x71   : > { %p5104_p4 = pnand %p5103_p1, %p5097_p7 }
  0x73   : > { %5107 = shalt.err (!%p5104_p4)
}
  0x74   : > { %s5192_s15 = smov 448   ;;  %s5193_s18 = smov 28  }
  0x75   : > { %4357 = dma.hbm_to_vmem [thread:$0]  (!%p5394_p11), %s5392_s10, 1792, %s5398_s22, %s5400_s13, %s5192_s15, %s5192_s15, %s5193_s18  }
  0x76   : > { %p5578_p9 = scmp.ne.s32.totalorder %s5572_s9, 0 }
  0x77   : > { %s5431_s21 = sand.u32 (!%p5578_p9), 1, %s5174_s25   ;;  %p5579_p0 = scmp.ne.s32.totalorder (!%p5578_p9), %s5569_s30, 0 }
  0x78   : > { %293 = sbr.rel (%p5578_p9) target bundleno = 1112 (0x458), region = 48  ;;  %s296_s29 = scalar_lea.sflag (!%p5578_p9), [#allocation3], %s5431_s21 }
  0x79   : > { %s4327_s23 = smul.u32 (!%p5578_p9), 112, %s5431_s21 }
  0x7b   : > { %s5435_s12 = scalar_lea.vmem (!%p5578_p9), [#allocation2], %s4327_s23 }
  0x7f   : > { %5153 = dma.done.wait (%p5579_p0), %s296_s29, 1792  }
  0x80   : > { %5155 = vsyncadd (%p5579_p0), %s296_s29, 4294965504  ;;  %p5580_p11 = scmp.eq.s32.totalorder %s5259_s28, 0 }
  0x82   : > { %5157 = dma.done.wait (%p5580_p11), [#allocation6], 45056   ;;  %p5581_p8 = pmov %p5580_p11 }
  0x84   : > { %5159 = vsyncadd (%p5581_p8), [#allocation6], 4294922240  ;;  %p5582_p13 = pmov %p5581_p8 }
  0x85   : > { %p5583_p6 = pmov %p5581_p8 }
  0x86   : > { %5161 = dma.done.wait (%p5582_p13), [#allocation9], 4096  }
  0x87   : > { %5163 = vsyncadd (%p5583_p6), [#allocation9], 4294963200  ;;  %v4414_v0 = vld [vmem:[#allocation5 + $0x4] ss:$16 sps:$4 sm:$0xff]   ;;  %v4416_v1 = vld [vmem:[#allocation5 + $0xc] ss:$16 sps:$4 sm:$0xff]  }
  0x88   : > { %1799 = vmatprep.subr.bf16.mxu0 %v4414_v0  ;;  %v4418_v2 = vld [vmem:[#allocation5] ss:$16 sps:$4 sm:$0xff]   ;;  %v4419_v3 = vld [vmem:[#allocation5 + $0x8] ss:$16 sps:$4 sm:$0xff]   ;;  %2011 = vmatprep.subr.bf16.mxu1 %v4416_v1  ;;  %v4420_v4 = vld [vmem:[#allocation5 + $0x24] ss:$16 sps:$4 sm:$0xff]  }
  0x89   : > { %1800 = vmatpush1.bf16.msra.mxu0 %v4418_v2  ;;  %2012 = vmatpush1.bf16.msra.mxu1 %v4419_v3  ;;  %v4422_v5 = vld [vmem:[#allocation5 + $0x2c] ss:$16 sps:$4 sm:$0xff]   ;;  %v4424_v6 = vld [vmem:[#allocation5 + $0x20] ss:$16 sps:$4 sm:$0xff]   ;;  %v4425_v7 = vld [vmem:[#allocation5 + $0x28] ss:$16 sps:$4 sm:$0xff]  }
  0x8a   : > { %1801 = vmatprep.subr.bf16.mxu0 %v4420_v4  ;;  %2013 = vmatprep.subr.bf16.mxu1 %v4422_v5  ;;  %v4426_v8 = vld [vmem:[#allocation5 + $0x44] ss:$16 sps:$4 sm:$0xff]   ;;  %v4428_v9 = vld [vmem:[#allocation5 + $0x4c] ss:$16 sps:$4 sm:$0xff]   ;;  %v4430_v10 = vld [vmem:[#allocation5 + $0x40] ss:$16 sps:$4 sm:$0xff]  }
  0x8b   : > { %v4431_v11 = vld [vmem:[#allocation5 + $0x48] ss:$16 sps:$4 sm:$0xff]   ;;  %v4432_v12 = vld [vmem:[#allocation5 + $0x64] ss:$16 sps:$4 sm:$0xff]   ;;  %v4434_v13 = vld [vmem:[#allocation5 + $0x6c] ss:$16 sps:$4 sm:$0xff]  }
  0x8c   : > { %v4436_v14 = vld [vmem:[#allocation5 + $0x60] ss:$16 sps:$4 sm:$0xff]   ;;  %v4437_v15 = vld [vmem:[#allocation5 + $0x68] ss:$16 sps:$4 sm:$0xff]   ;;  %v4438_v16 = vld [vmem:[#allocation5 + $0x84] ss:$16 sps:$4 sm:$0xff]  }
  0x8d   : > { %1802 = vmatpush1.bf16.msra.mxu0 %v4424_v6  ;;  %2014 = vmatpush1.bf16.msra.mxu1 %v4425_v7  ;;  %v4440_v17 = vld [vmem:[#allocation5 + $0x8c] ss:$16 sps:$4 sm:$0xff]   ;;  %v4442_v18 = vld [vmem:[#allocation5 + $0x80] ss:$16 sps:$4 sm:$0xff]   ;;  %v4443_v19 = vld [vmem:[#allocation5 + $0x88] ss:$16 sps:$4 sm:$0xff]  }
  0x8e   : > { %1803 = vmatprep.subr.bf16.mxu0 %v4426_v8  ;;  %2015 = vmatprep.subr.bf16.mxu1 %v4428_v9  ;;  %v4444_v20 = vld [vmem:[#allocation5 + $0xa4] ss:$16 sps:$4 sm:$0xff]   ;;  %v4446_v21 = vld [vmem:[#allocation5 + $0xac] ss:$16 sps:$4 sm:$0xff]   ;;  %v4448_v22 = vld [vmem:[#allocation5 + $0xa0] ss:$16 sps:$4 sm:$0xff]  }
  0x8f   : > { %v4449_v23 = vld [vmem:[#allocation5 + $0xa8] ss:$16 sps:$4 sm:$0xff]   ;;  %v4450_v24 = vld [vmem:[#allocation5 + $0xc4] ss:$16 sps:$4 sm:$0xff]   ;;  %v4452_v25 = vld [vmem:[#allocation5 + $0xcc] ss:$16 sps:$4 sm:$0xff]  }
  0x90   : > { %v4454_v26 = vld [vmem:[#allocation5 + $0xc0] ss:$16 sps:$4 sm:$0xff]   ;;  %v4455_v27 = vld [vmem:[#allocation5 + $0xc8] ss:$16 sps:$4 sm:$0xff]   ;;  %v4456_v28 = vld [vmem:[#allocation5 + $0xe4] ss:$16 sps:$4 sm:$0xff]  }
  0x91   : > { %1804 = vmatpush1.bf16.msra.mxu0 %v4430_v10  ;;  %2016 = vmatpush1.bf16.msra.mxu1 %v4431_v11  ;;  %v4458_v29 = vld [vmem:[#allocation5 + $0xec] ss:$16 sps:$4 sm:$0xff]   ;;  %v4460_v30 = vld [vmem:[#allocation5 + $0xe0] ss:$16 sps:$4 sm:$0xff]   ;;  %v4461_v31 = vld [vmem:[#allocation5 + $0xe8] ss:$16 sps:$4 sm:$0xff]  }
  0x92   : > { %1805 = vmatprep.subr.bf16.mxu0 %v4432_v12  ;;  %2017 = vmatprep.subr.bf16.mxu1 %v4434_v13  ;;  %v4462_v32 = vld [vmem:[#allocation5 + $0x104] ss:$16 sps:$4 sm:$0xff]   ;;  %v4464_v33 = vld [vmem:[#allocation5 + $0x10c] ss:$16 sps:$4 sm:$0xff]   ;;  %v4466_v34 = vld [vmem:[#allocation5 + $0x100] ss:$16 sps:$4 sm:$0xff]  }
  0x93   : > { %v4467_v35 = vld [vmem:[#allocation5 + $0x108] ss:$16 sps:$4 sm:$0xff]   ;;  %v4468_v36 = vld [vmem:[#allocation5 + $0x124] ss:$16 sps:$4 sm:$0xff]   ;;  %v4470_v37 = vld [vmem:[#allocation5 + $0x12c] ss:$16 sps:$4 sm:$0xff]  }
  0x94   : > { %v4472_v38 = vld [vmem:[#allocation5 + $0x120] ss:$16 sps:$4 sm:$0xff]   ;;  %v4473_v39 = vld [vmem:[#allocation5 + $0x128] ss:$16 sps:$4 sm:$0xff]   ;;  %v4474_v40 = vld [vmem:[#allocation5 + $0x144] ss:$16 sps:$4 sm:$0xff]  }
  0x95   : > { %1806 = vmatpush1.bf16.msra.mxu0 %v4436_v14  ;;  %2018 = vmatpush1.bf16.msra.mxu1 %v4437_v15  ;;  %v4476_v41 = vld [vmem:[#allocation5 + $0x14c] ss:$16 sps:$4 sm:$0xff]   ;;  %v4478_v42 = vld [vmem:[#allocation5 + $0x140] ss:$16 sps:$4 sm:$0xff]   ;;  %v4479_v43 = vld [vmem:[#allocation5 + $0x148] ss:$16 sps:$4 sm:$0xff]  }
  0x96   : > { %1807 = vmatprep.subr.bf16.mxu0 %v4438_v16  ;;  %2019 = vmatprep.subr.bf16.mxu1 %v4440_v17  ;;  %v4480_v44 = vld [vmem:[#allocation5 + $0x164] ss:$16 sps:$4 sm:$0xff]   ;;  %v4482_v45 = vld [vmem:[#allocation5 + $0x16c] ss:$16 sps:$4 sm:$0xff]   ;;  %v4484_v46 = vld [vmem:[#allocation5 + $0x160] ss:$16 sps:$4 sm:$0xff]  }
  0x97   : > { %v4485_v47 = vld [vmem:[#allocation5 + $0x168] ss:$16 sps:$4 sm:$0xff]   ;;  %v4512_v48 = vld [vmem:[%s5435_s12 + $0x4] ss:$28 sps:$4 sm:$0xff]   ;;  %v4488_v50 = vld [vmem:[#allocation5 + $0x18c] ss:$16 sps:$4 sm:$0xff]  }
  0x98   : > { %v4486_v49 = vld [vmem:[#allocation5 + $0x184] ss:$16 sps:$4 sm:$0xff]   ;;  %1831 = vmatprep.mubr.bf16.mxu0 %v4512_v48  ;;  %2043 = vmatprep.mubr.bf16.mxu1 %v4512_v48  ;;  %v4490_v51 = vld [vmem:[#allocation5 + $0x180] ss:$16 sps:$4 sm:$0xff]   ;;  %v4491_v52 = vld [vmem:[#allocation5 + $0x188] ss:$16 sps:$4 sm:$0xff]  }
  0x99   : > { %1808 = vmatpush1.bf16.msra.mxu0 %v4442_v18  ;;  %2020 = vmatpush1.bf16.msra.mxu1 %v4443_v19  ;;  %v4492_v53 = vld [vmem:[#allocation5 + $0x1a4] ss:$16 sps:$4 sm:$0xff]   ;;  %v4494_v54 = vld [vmem:[#allocation5 + $0x1ac] ss:$16 sps:$4 sm:$0xff]   ;;  %v4496_v55 = vld [vmem:[#allocation5 + $0x1a0] ss:$16 sps:$4 sm:$0xff]  }
  0x9a   : > { %1809 = vmatprep.subr.bf16.mxu0 %v4444_v20  ;;  %2021 = vmatprep.subr.bf16.mxu1 %v4446_v21  ;;  %v4497_v56 = vld [vmem:[#allocation5 + $0x1a8] ss:$16 sps:$4 sm:$0xff]   ;;  %v4498_v57 = vld [vmem:[#allocation5 + $0x1c4] ss:$16 sps:$4 sm:$0xff]   ;;  %v4500_v58 = vld [vmem:[#allocation5 + $0x1cc] ss:$16 sps:$4 sm:$0xff]  }
  0x9b   : > { %v4502_v59 = vld [vmem:[#allocation5 + $0x1c0] ss:$16 sps:$4 sm:$0xff]   ;;  %v4503_v60 = vld [vmem:[#allocation5 + $0x1c8] ss:$16 sps:$4 sm:$0xff]   ;;  %v4504_v61 = vld [vmem:[#allocation5 + $0x1e4] ss:$16 sps:$4 sm:$0xff]  }
  0x9c   : > { %v4506_v62 = vld [vmem:[#allocation5 + $0x1ec] ss:$16 sps:$4 sm:$0xff]   ;;  %v4508_v63 = vld [vmem:[#allocation5 + $0x1e0] ss:$16 sps:$4 sm:$0xff]   ;;  %v4509_v0 = vld [vmem:[#allocation5 + $0x1e8] ss:$16 sps:$4 sm:$0xff]  }
  0x9d   : > { %1810 = vmatpush1.bf16.msra.mxu0 %v4448_v22  ;;  %2022 = vmatpush1.bf16.msra.mxu1 %v4449_v23  ;;  %v4515_v1 = vld [vmem:[#allocation5 + $0x204] ss:$16 sps:$4 sm:$0xff]   ;;  %v4518_v2 = vld [vmem:[#allocation5 + $0x20c] ss:$16 sps:$4 sm:$0xff]   ;;  %v4513_v4 = vld [vmem:[#allocation5 + $0x200] ss:$16 sps:$4 sm:$0xff]  }
  0x9e   : > { %1811 = vmatprep.subr.bf16.mxu0 %v4450_v24  ;;  %2023 = vmatprep.subr.bf16.mxu1 %v4452_v25  ;;  %v4510_v3 = vld [vmem:[%s5435_s12] ss:$28 sps:$4 sm:$0xff]   ;;  %v4516_v5 = vld [vmem:[#allocation5 + $0x208] ss:$16 sps:$4 sm:$0xff]   ;;  %v4521_v6 = vld [vmem:[#allocation5 + $0x224] ss:$16 sps:$4 sm:$0xff]  }
  0x9f   : > { %v4524_v7 = vld [vmem:[#allocation5 + $0x22c] ss:$16 sps:$4 sm:$0xff]   ;;  %v4519_v8 = vld [vmem:[#allocation5 + $0x220] ss:$16 sps:$4 sm:$0xff]   ;;  %v4522_v9 = vld [vmem:[#allocation5 + $0x228] ss:$16 sps:$4 sm:$0xff]  }
  0xa0   : > { %v4527_v10 = vld [vmem:[#allocation5 + $0x244] ss:$16 sps:$4 sm:$0xff]   ;;  %v4530_v11 = vld [vmem:[#allocation5 + $0x24c] ss:$16 sps:$4 sm:$0xff]   ;;  %v4525_v12 = vld [vmem:[#allocation5 + $0x240] ss:$16 sps:$4 sm:$0xff]  }
  0xa1   : > { %1812 = vmatpush1.bf16.msra.mxu0 %v4454_v26  ;;  %2024 = vmatpush1.bf16.msra.mxu1 %v4455_v27  ;;  %v4528_v13 = vld [vmem:[#allocation5 + $0x248] ss:$16 sps:$4 sm:$0xff]   ;;  %v4533_v14 = vld [vmem:[#allocation5 + $0x264] ss:$16 sps:$4 sm:$0xff]   ;;  %v4536_v15 = vld [vmem:[#allocation5 + $0x26c] ss:$16 sps:$4 sm:$0xff]  }
  0xa2   : > { %1813 = vmatprep.subr.bf16.mxu0 %v4456_v28  ;;  %2025 = vmatprep.subr.bf16.mxu1 %v4458_v29  ;;  %v4531_v16 = vld [vmem:[#allocation5 + $0x260] ss:$16 sps:$4 sm:$0xff]   ;;  %v4534_v17 = vld [vmem:[#allocation5 + $0x268] ss:$16 sps:$4 sm:$0xff]   ;;  %v4539_v18 = vld [vmem:[#allocation5 + $0x284] ss:$16 sps:$4 sm:$0xff]  }
  0xa3   : > { %v4542_v19 = vld [vmem:[#allocation5 + $0x28c] ss:$16 sps:$4 sm:$0xff]   ;;  %v4537_v20 = vld [vmem:[#allocation5 + $0x280] ss:$16 sps:$4 sm:$0xff]   ;;  %v4540_v21 = vld [vmem:[#allocation5 + $0x288] ss:$16 sps:$4 sm:$0xff]  }
  0xa4   : > { %v4545_v22 = vld [vmem:[#allocation5 + $0x2a4] ss:$16 sps:$4 sm:$0xff]   ;;  %v4548_v23 = vld [vmem:[#allocation5 + $0x2ac] ss:$16 sps:$4 sm:$0xff]   ;;  %v4543_v25 = vld [vmem:[#allocation5 + $0x2a0] ss:$16 sps:$4 sm:$0xff]  }
  0xa5   : > { %1814 = vmatpush1.bf16.msra.mxu0 %v4460_v30  ;;  %2026 = vmatpush1.bf16.msra.mxu1 %v4461_v31  ;;  %v4597_v24 = vld [vmem:[%s5435_s12 + $0x3c] ss:$28 sps:$4 sm:$0xff]   ;;  %v4551_v27 = vld [vmem:[#allocation5 + $0x2c4] ss:$16 sps:$4 sm:$0xff]   ;;  %v4549_v30 = vld [vmem:[#allocation5 + $0x2c0] ss:$16 sps:$4 sm:$0xff]  }
  0xa6   : > { %1815 = vmatprep.subr.bf16.mxu0 %v4462_v32  ;;  %2027 = vmatprep.subr.bf16.mxu1 %v4464_v33  ;;  %v4546_v26 = vld [vmem:[#allocation5 + $0x2a8] ss:$16 sps:$4 sm:$0xff]   ;;  %v4554_v28 = vld [vmem:[#allocation5 + $0x2cc] ss:$16 sps:$4 sm:$0xff]   ;;  %v4557_v32 = vld [vmem:[#allocation5 + $0x2e4] ss:$16 sps:$4 sm:$0xff]  }
  0xa7   : > { %v4605_v29 = vld [vmem:[%s5435_s12 + $0x38] ss:$28 sps:$4 sm:$0xff]   ;;  %v4560_v33 = vld [vmem:[#allocation5 + $0x2ec] ss:$16 sps:$4 sm:$0xff]   ;;  %s3767_s16 = sshll.u32 %s5431_s21, 5  ;;  %s4172_s15 = sshll.u32 %s5259_s28, 9 }
  0xa8   : > { %v4552_v31 = vld [vmem:[#allocation5 + $0x2c8] ss:$16 sps:$4 sm:$0xff]   ;;  %s341_s14 = scalar_lea.vmem [#allocation10], %s3767_s16  ;;  %s5513_s29 = scalar_lea.hbm %s5564_s7, %s4172_s15 }
  0xa9   : > { %1816 = vmatpush1.bf16.msra.mxu0 %v4466_v34  ;;  %2028 = vmatpush1.bf16.msra.mxu1 %v4467_v35  ;;  %v4614_v34 = vld [vmem:[%s5435_s12 + $0xc] ss:$28 sps:$4 sm:$0xff]   ;;  %v4555_v35 = vld [vmem:[#allocation5 + $0x2e0] ss:$16 sps:$4 sm:$0xff]   ;;  %s3652_s17 = sshll.u32 %s341_s14, 4  ;;  %s5195_s28 = smov [#allocation10]   ;;  %s5508_s17 = int_to_ptr.vmem [resolvable:$true] %s3652_s17 }
  0xaa   : > { %1817 = vmatprep.subr.bf16.mxu0 %v4468_v36  ;;  %2029 = vmatprep.subr.bf16.mxu1 %v4470_v37  ;;  %v4558_v36 = vld [vmem:[#allocation5 + $0x2e8] ss:$16 sps:$4 sm:$0xff]   ;;  %v4563_v37 = vld [vmem:[#allocation5 + $0x304] ss:$16 sps:$4 sm:$0xff]   ;;  %s5108_s30 = scalar_lea.vmem %s5508_s17, 512  ;;  %s5112_s9 = sshll.u32 %s5195_s28, 4  ;;  %s5113_s9 = int_to_ptr.vmem [resolvable:$false] %s5112_s9 }
  0xab   : > { %v4576_v48 = vld [vmem:[#allocation5 + $0x348] ss:$16 sps:$4 sm:$0xff]   ;;  %p5109_p10 = scmp.ne.s32.totalorder %s5508_s17, %s5108_s30  ;;  %s5114_s10 = scalar_lea.vmem %s5113_s9, 1024 }
  0xac   : > { %p5115_p12 = scmp.lt.s32.totalorder %s5508_s17, %s5113_s9  ;;  %p5116_p2 = scmp.lt.s32.totalorder %s5114_s10, %s5108_s30 }
  0xad   : > { %1818 = vmatpush1.bf16.msra.mxu0 %v4472_v38  ;;  %2030 = vmatpush1.bf16.msra.mxu1 %v4473_v39  ;;  %v4566_v38 = vld [vmem:[#allocation5 + $0x30c] ss:$16 sps:$4 sm:$0xff]   ;;  %v4561_v39 = vld [vmem:[#allocation5 + $0x300] ss:$16 sps:$4 sm:$0xff]   ;;  %p5110_p3 = pnand %p5109_p10, %p5383_p5 }
  0xae   : > { %1819 = vmatprep.subr.bf16.mxu0 %v4474_v40  ;;  %2031 = vmatprep.subr.bf16.mxu1 %v4476_v41  ;;  %v4564_v40 = vld [vmem:[#allocation5 + $0x308] ss:$16 sps:$4 sm:$0xff]   ;;  %v4569_v41 = vld [vmem:[#allocation5 + $0x324] ss:$16 sps:$4 sm:$0xff]   ;;  %p5117_p1 = por %p5116_p2, %p5115_p12 }
  0xaf   : > { %p5111_p7 = pneg %p5110_p3 }
  0xb1   : > { %1820 = vmatpush1.bf16.msra.mxu0 %v4478_v42  ;;  %2032 = vmatpush1.bf16.msra.mxu1 %v4479_v43  ;;  %v4572_v42 = vld [vmem:[#allocation5 + $0x32c] ss:$16 sps:$4 sm:$0xff]   ;;  %v4567_v43 = vld [vmem:[#allocation5 + $0x320] ss:$16 sps:$4 sm:$0xff]   ;;  %p5118_p4 = pnand %p5117_p1, %p5111_p7 }
  0xb2   : > { %1821 = vmatprep.subr.bf16.mxu0 %v4480_v44  ;;  %2033 = vmatprep.subr.bf16.mxu1 %v4482_v45  ;;  %v4570_v44 = vld [vmem:[#allocation5 + $0x328] ss:$16 sps:$4 sm:$0xff]   ;;  %v4575_v45 = vld [vmem:[#allocation5 + $0x344] ss:$16 sps:$4 sm:$0xff]  }
  0xb5   : > { %1822 = vmatpush1.bf16.msra.mxu0 %v4484_v46  ;;  %2034 = vmatpush1.bf16.msra.mxu1 %v4485_v47  ;;  %v4578_v46 = vld [vmem:[#allocation5 + $0x34c] ss:$16 sps:$4 sm:$0xff]   ;;  %v4573_v47 = vld [vmem:[#allocation5 + $0x340] ss:$16 sps:$4 sm:$0xff]  }
  0xb6   : > { %1823 = vmatprep.subr.bf16.mxu0 %v4486_v49  ;;  %2035 = vmatprep.subr.bf16.mxu1 %v4488_v50  ;;  %v4581_v49 = vld [vmem:[#allocation5 + $0x364] ss:$16 sps:$4 sm:$0xff]   ;;  %v4584_v50 = vld [vmem:[#allocation5 + $0x36c] ss:$16 sps:$4 sm:$0xff]  }
  0xb9   : > { %1824 = vmatpush1.bf16.msra.mxu0 %v4490_v51  ;;  %2036 = vmatpush1.bf16.msra.mxu1 %v4491_v52  ;;  %v4579_v51 = vld [vmem:[#allocation5 + $0x360] ss:$16 sps:$4 sm:$0xff]   ;;  %v4582_v52 = vld [vmem:[#allocation5 + $0x368] ss:$16 sps:$4 sm:$0xff]  }
  0xba   : > { %1825 = vmatprep.subr.bf16.mxu0 %v4492_v53  ;;  %2037 = vmatprep.subr.bf16.mxu1 %v4494_v54  ;;  %v4587_v53 = vld [vmem:[#allocation5 + $0x384] ss:$16 sps:$4 sm:$0xff]   ;;  %v4590_v54 = vld [vmem:[#allocation5 + $0x38c] ss:$16 sps:$4 sm:$0xff]  }
  0xbd   : > { %1826 = vmatpush1.bf16.msra.mxu0 %v4496_v55  ;;  %2038 = vmatpush1.bf16.msra.mxu1 %v4497_v56  ;;  %v4585_v55 = vld [vmem:[#allocation5 + $0x380] ss:$16 sps:$4 sm:$0xff]   ;;  %v4588_v56 = vld [vmem:[#allocation5 + $0x388] ss:$16 sps:$4 sm:$0xff]  }
  0xbe   : > { %1827 = vmatprep.subr.bf16.mxu0 %v4498_v57  ;;  %2039 = vmatprep.subr.bf16.mxu1 %v4500_v58  ;;  %v4593_v57 = vld [vmem:[#allocation5 + $0x3a4] ss:$16 sps:$4 sm:$0xff]   ;;  %v4596_v58 = vld [vmem:[#allocation5 + $0x3ac] ss:$16 sps:$4 sm:$0xff]  }
  0xc1   : > { %1828 = vmatpush1.bf16.msra.mxu0 %v4502_v59  ;;  %2040 = vmatpush1.bf16.msra.mxu1 %v4503_v60  ;;  %v4591_v59 = vld [vmem:[#allocation5 + $0x3a0] ss:$16 sps:$4 sm:$0xff]   ;;  %v4594_v60 = vld [vmem:[#allocation5 + $0x3a8] ss:$16 sps:$4 sm:$0xff]  }
  0xc2   : > { %1829 = vmatprep.subr.bf16.mxu0 %v4504_v61  ;;  %2041 = vmatprep.subr.bf16.mxu1 %v4506_v62  ;;  %v4601_v61 = vld [vmem:[#allocation5 + $0x3c4] ss:$16 sps:$4 sm:$0xff]   ;;  %v4604_v62 = vld [vmem:[#allocation5 + $0x3cc] ss:$16 sps:$4 sm:$0xff]  }
  0xc5   : > { %1830 = vmatpush1.bf16.msra.mxu0 %v4508_v63  ;;  %2042 = vmatpush1.bf16.msra.mxu1 %v4509_v0  ;;  %v4599_v63 = vld [vmem:[#allocation5 + $0x3c0] ss:$16 sps:$4 sm:$0xff]   ;;  %v4602_v0 = vld [vmem:[#allocation5 + $0x3c8] ss:$16 sps:$4 sm:$0xff]  }
  0xc6   : > { %1852 = vmatprep.subr.bf16.mxu0 %v4515_v1  ;;  %2064 = vmatprep.subr.bf16.mxu1 %v4518_v2  ;;  %v4608_v1 = vld [vmem:[#allocation5 + $0x3e4] ss:$16 sps:$4 sm:$0xff]   ;;  %v4611_v2 = vld [vmem:[#allocation5 + $0x3ec] ss:$16 sps:$4 sm:$0xff]  }
  0xc8   : > { %1832 = vmatmul.mubr.bf16.vlgmr.msra.gmra.mrb[0].mxu0 %v4510_v3  ;;  %2044 = vmatmul.mubr.bf16.vlgmr.msra.gmra.mrb[0].mxu1 %v4510_v3  ;;  %v4606_v3 = vld [vmem:[#allocation5 + $0x3e0] ss:$16 sps:$4 sm:$0xff]  }
  0xc9   : > { %1853 = vmatpush1.bf16.msra.mxu0 %v4513_v4  ;;  %2065 = vmatpush1.bf16.msra.mxu1 %v4516_v5  ;;  %v4609_v4 = vld [vmem:[#allocation5 + $0x3e8] ss:$16 sps:$4 sm:$0xff]   ;;  %v4617_v5 = vld [vmem:[#allocation5 + $0x404] ss:$16 sps:$4 sm:$0xff]  }
  0xca   : > { %1854 = vmatprep.subr.bf16.mxu0 %v4521_v6  ;;  %2066 = vmatprep.subr.bf16.mxu1 %v4524_v7  ;;  %v4620_v6 = vld [vmem:[#allocation5 + $0x40c] ss:$16 sps:$4 sm:$0xff]   ;;  %v4612_v7 = vld [vmem:[%s5435_s12 + $0x8] ss:$28 sps:$4 sm:$0xff]  }
  0xcb   : > { %1841 = vmatprep.mubr.bf16.mxu0 %v4597_v24  ;;  %2053 = vmatprep.mubr.bf16.mxu1 %v4597_v24  ;;  %v4636_v24 = vld [vmem:[#allocation5 + $0x468] ss:$16 sps:$4 sm:$0xff]  }
  0xcd   : > { %1855 = vmatpush1.bf16.msra.mxu0 %v4519_v8  ;;  %2067 = vmatpush1.bf16.msra.mxu1 %v4522_v9  ;;  %v4615_v8 = vld [vmem:[#allocation5 + $0x400] ss:$16 sps:$4 sm:$0xff]   ;;  %v4618_v9 = vld [vmem:[#allocation5 + $0x408] ss:$16 sps:$4 sm:$0xff]  }
  0xce   : > { %1856 = vmatprep.subr.bf16.mxu0 %v4527_v10  ;;  %2068 = vmatprep.subr.bf16.mxu1 %v4530_v11  ;;  %v4623_v10 = vld [vmem:[#allocation5 + $0x424] ss:$16 sps:$4 sm:$0xff]   ;;  %v4626_v11 = vld [vmem:[#allocation5 + $0x42c] ss:$16 sps:$4 sm:$0xff]  }
  0xd0   : > { %1842 = vmatmul.mubr.bf16.gmra.mrb[4].mxu0 %v4605_v29  ;;  %2054 = vmatmul.mubr.bf16.gmra.mrb[4].mxu1 %v4605_v29  ;;  %v4647_v29 = vld [vmem:[#allocation5 + $0x4a4] ss:$16 sps:$4 sm:$0xff]  }
  0xd1   : > { %1857 = vmatpush1.bf16.msra.mxu0 %v4525_v12  ;;  %2069 = vmatpush1.bf16.msra.mxu1 %v4528_v13  ;;  %v4699_v12 = vld [vmem:[%s5435_s12 + $0x44] ss:$28 sps:$4 sm:$0xff]  }
  0xd2   : > { %1858 = vmatprep.subr.bf16.mxu0 %v4533_v14  ;;  %2070 = vmatprep.subr.bf16.mxu1 %v4536_v15  ;;  %v4621_v13 = vld [vmem:[#allocation5 + $0x420] ss:$16 sps:$4 sm:$0xff]   ;;  %v4624_v14 = vld [vmem:[#allocation5 + $0x428] ss:$16 sps:$4 sm:$0xff]   ;;  %v4629_v15 = vld [vmem:[#allocation5 + $0x444] ss:$16 sps:$4 sm:$0xff]  }
  0xd3   : > { %1884 = vmatprep.mubr.bf16.mxu0 %v4614_v34  ;;  %2096 = vmatprep.mubr.bf16.mxu1 %v4614_v34  ;;  %v4656_v34 = vld [vmem:[#allocation5 + $0x4cc] ss:$16 sps:$4 sm:$0xff]  }
  0xd5   : > { %1859 = vmatpush1.bf16.msra.mxu0 %v4531_v16  ;;  %2071 = vmatpush1.bf16.msra.mxu1 %v4534_v17  ;;  %v4632_v16 = vld [vmem:[#allocation5 + $0x44c] ss:$16 sps:$4 sm:$0xff]   ;;  %v4627_v17 = vld [vmem:[#allocation5 + $0x440] ss:$16 sps:$4 sm:$0xff]  }
  0xd6   : > { %1860 = vmatprep.subr.bf16.mxu0 %v4539_v18  ;;  %2072 = vmatprep.subr.bf16.mxu1 %v4542_v19  ;;  %v4630_v18 = vld [vmem:[#allocation5 + $0x448] ss:$16 sps:$4 sm:$0xff]   ;;  %v4707_v19 = vld [vmem:[%s5435_s12 + $0x40] ss:$28 sps:$4 sm:$0xff]  }
  0xd9   : > { %1861 = vmatpush1.bf16.msra.mxu0 %v4537_v20  ;;  %2073 = vmatpush1.bf16.msra.mxu1 %v4540_v21  ;;  %v4635_v20 = vld [vmem:[#allocation5 + $0x464] ss:$16 sps:$4 sm:$0xff]   ;;  %v4638_v21 = vld [vmem:[#allocation5 + $0x46c] ss:$16 sps:$4 sm:$0xff]  }
  0xda   : > { %1862 = vmatprep.subr.bf16.mxu0 %v4545_v22  ;;  %2074 = vmatprep.subr.bf16.mxu1 %v4548_v23  ;;  %v4716_v22 = vld [vmem:[%s5435_s12 + $0x14] ss:$28 sps:$4 sm:$0xff]  }
  0xdb   : > { %v4633_v23 = vld [vmem:[#allocation5 + $0x460] ss:$16 sps:$4 sm:$0xff]  }
  0xdd   : > { %1863 = vmatpush1.bf16.msra.mxu0 %v4543_v25  ;;  %2075 = vmatpush1.bf16.msra.mxu1 %v4546_v26  ;;  %v4641_v25 = vld [vmem:[#allocation5 + $0x484] ss:$16 sps:$4 sm:$0xff]   ;;  %v4644_v26 = vld [vmem:[#allocation5 + $0x48c] ss:$16 sps:$4 sm:$0xff]  }
  0xde   : > { %1864 = vmatprep.subr.bf16.mxu0 %v4551_v27  ;;  %2076 = vmatprep.subr.bf16.mxu1 %v4554_v28  ;;  %v4639_v27 = vld [vmem:[#allocation5 + $0x480] ss:$16 sps:$4 sm:$0xff]   ;;  %v4642_v28 = vld [vmem:[#allocation5 + $0x488] ss:$16 sps:$4 sm:$0xff]  }
  0xe1   : > { %1865 = vmatpush1.bf16.msra.mxu0 %v4549_v30  ;;  %2077 = vmatpush1.bf16.msra.mxu1 %v4552_v31  ;;  %v4650_v30 = vld [vmem:[#allocation5 + $0x4ac] ss:$16 sps:$4 sm:$0xff]   ;;  %v4645_v31 = vld [vmem:[#allocation5 + $0x4a0] ss:$16 sps:$4 sm:$0xff]  }
  0xe2   : > { %1866 = vmatprep.subr.bf16.mxu0 %v4557_v32  ;;  %2078 = vmatprep.subr.bf16.mxu1 %v4560_v33  ;;  %v4648_v32 = vld [vmem:[#allocation5 + $0x4a8] ss:$16 sps:$4 sm:$0xff]   ;;  %v4653_v33 = vld [vmem:[#allocation5 + $0x4c4] ss:$16 sps:$4 sm:$0xff]  }
  0xe5   : > { %1867 = vmatpush1.bf16.msra.mxu0 %v4555_v35  ;;  %2079 = vmatpush1.bf16.msra.mxu1 %v4558_v36  ;;  %v4651_v35 = vld [vmem:[#allocation5 + $0x4c0] ss:$16 sps:$4 sm:$0xff]   ;;  %v4654_v36 = vld [vmem:[#allocation5 + $0x4c8] ss:$16 sps:$4 sm:$0xff]  }
  0xe6   : > { %1868 = vmatprep.subr.bf16.mxu0 %v4563_v37  ;;  %2080 = vmatprep.subr.bf16.mxu1 %v4566_v38  ;;  %v4659_v37 = vld [vmem:[#allocation5 + $0x4e4] ss:$16 sps:$4 sm:$0xff]   ;;  %v4662_v38 = vld [vmem:[#allocation5 + $0x4ec] ss:$16 sps:$4 sm:$0xff]  }
  0xe9   : > { %1869 = vmatpush1.bf16.msra.mxu0 %v4561_v39  ;;  %2081 = vmatpush1.bf16.msra.mxu1 %v4564_v40  ;;  %v4657_v39 = vld [vmem:[#allocation5 + $0x4e0] ss:$16 sps:$4 sm:$0xff]   ;;  %v4660_v40 = vld [vmem:[#allocation5 + $0x4e8] ss:$16 sps:$4 sm:$0xff]  }
  0xea   : > { %1870 = vmatprep.subr.bf16.mxu0 %v4569_v41  ;;  %2082 = vmatprep.subr.bf16.mxu1 %v4572_v42  ;;  %v4665_v41 = vld [vmem:[#allocation5 + $0x504] ss:$16 sps:$4 sm:$0xff]   ;;  %v4668_v42 = vld [vmem:[#allocation5 + $0x50c] ss:$16 sps:$4 sm:$0xff]  }
  0xed   : > { %1871 = vmatpush1.bf16.msra.mxu0 %v4567_v43  ;;  %2083 = vmatpush1.bf16.msra.mxu1 %v4570_v44  ;;  %v4663_v43 = vld [vmem:[#allocation5 + $0x500] ss:$16 sps:$4 sm:$0xff]   ;;  %v4666_v44 = vld [vmem:[#allocation5 + $0x508] ss:$16 sps:$4 sm:$0xff]  }
  0xee   : > { %1872 = vmatprep.subr.bf16.mxu0 %v4575_v45  ;;  %2084 = vmatprep.subr.bf16.mxu1 %v4578_v46  ;;  %v4671_v45 = vld [vmem:[#allocation5 + $0x524] ss:$16 sps:$4 sm:$0xff]   ;;  %v4674_v46 = vld [vmem:[#allocation5 + $0x52c] ss:$16 sps:$4 sm:$0xff]  }
  0xf1   : > { %1873 = vmatpush1.bf16.msra.mxu0 %v4573_v47  ;;  %2085 = vmatpush1.bf16.msra.mxu1 %v4576_v48  ;;  %v4669_v47 = vld [vmem:[#allocation5 + $0x520] ss:$16 sps:$4 sm:$0xff]   ;;  %v4672_v48 = vld [vmem:[#allocation5 + $0x528] ss:$16 sps:$4 sm:$0xff]  }
  0xf2   : > { %1874 = vmatprep.subr.bf16.mxu0 %v4581_v49  ;;  %2086 = vmatprep.subr.bf16.mxu1 %v4584_v50  ;;  %v4677_v49 = vld [vmem:[#allocation5 + $0x544] ss:$16 sps:$4 sm:$0xff]   ;;  %v4680_v50 = vld [vmem:[#allocation5 + $0x54c] ss:$16 sps:$4 sm:$0xff]  }
  0xf5   : > { %1875 = vmatpush1.bf16.msra.mxu0 %v4579_v51  ;;  %2087 = vmatpush1.bf16.msra.mxu1 %v4582_v52  ;;  %v4675_v51 = vld [vmem:[#allocation5 + $0x540] ss:$16 sps:$4 sm:$0xff]   ;;  %v4678_v52 = vld [vmem:[#allocation5 + $0x548] ss:$16 sps:$4 sm:$0xff]  }
  0xf6   : > { %1876 = vmatprep.subr.bf16.mxu0 %v4587_v53  ;;  %2088 = vmatprep.subr.bf16.mxu1 %v4590_v54  ;;  %v4683_v53 = vld [vmem:[#allocation5 + $0x564] ss:$16 sps:$4 sm:$0xff]   ;;  %v4686_v54 = vld [vmem:[#allocation5 + $0x56c] ss:$16 sps:$4 sm:$0xff]  }
  0xf9   : > { %1877 = vmatpush1.bf16.msra.mxu0 %v4585_v55  ;;  %2089 = vmatpush1.bf16.msra.mxu1 %v4588_v56  ;;  %v4681_v55 = vld [vmem:[#allocation5 + $0x560] ss:$16 sps:$4 sm:$0xff]   ;;  %v4684_v56 = vld [vmem:[#allocation5 + $0x568] ss:$16 sps:$4 sm:$0xff]  }
  0xfa   : > { %1878 = vmatprep.subr.bf16.mxu0 %v4593_v57  ;;  %2090 = vmatprep.subr.bf16.mxu1 %v4596_v58  ;;  %v4689_v57 = vld [vmem:[#allocation5 + $0x584] ss:$16 sps:$4 sm:$0xff]   ;;  %v4692_v58 = vld [vmem:[#allocation5 + $0x58c] ss:$16 sps:$4 sm:$0xff]  }
  0xfd   : > { %1879 = vmatpush1.bf16.msra.mxu0 %v4591_v59  ;;  %2091 = vmatpush1.bf16.msra.mxu1 %v4594_v60  ;;  %v4687_v59 = vld [vmem:[#allocation5 + $0x580] ss:$16 sps:$4 sm:$0xff]   ;;  %v4690_v60 = vld [vmem:[#allocation5 + $0x588] ss:$16 sps:$4 sm:$0xff]  }
  0xfe   : > { %1880 = vmatprep.subr.bf16.mxu0 %v4601_v61  ;;  %2092 = vmatprep.subr.bf16.mxu1 %v4604_v62  ;;  %v4695_v61 = vld [vmem:[#allocation5 + $0x5a4] ss:$16 sps:$4 sm:$0xff]   ;;  %v4698_v62 = vld [vmem:[#allocation5 + $0x5ac] ss:$16 sps:$4 sm:$0xff]  }
 0x101   : > { %1881 = vmatpush1.bf16.msra.mxu0 %v4599_v63  ;;  %2093 = vmatpush1.bf16.msra.mxu1 %v4602_v0  ;;  %v4693_v63 = vld [vmem:[#allocation5 + $0x5a0] ss:$16 sps:$4 sm:$0xff]   ;;  %v4696_v0 = vld [vmem:[#allocation5 + $0x5a8] ss:$16 sps:$4 sm:$0xff]  }
 0x102   : > { %1882 = vmatprep.subr.bf16.mxu0 %v4608_v1  ;;  %2094 = vmatprep.subr.bf16.mxu1 %v4611_v2  ;;  %v4703_v1 = vld [vmem:[#allocation5 + $0x5c4] ss:$16 sps:$4 sm:$0xff]   ;;  %v4706_v2 = vld [vmem:[#allocation5 + $0x5cc] ss:$16 sps:$4 sm:$0xff]  }
 0x105   : > { %1883 = vmatpush1.bf16.msra.mxu0 %v4606_v3  ;;  %2095 = vmatpush1.bf16.msra.mxu1 %v4609_v4  ;;  %v4701_v3 = vld [vmem:[#allocation5 + $0x5c0] ss:$16 sps:$4 sm:$0xff]   ;;  %v4704_v4 = vld [vmem:[#allocation5 + $0x5c8] ss:$16 sps:$4 sm:$0xff]  }
 0x106   : > { %1905 = vmatprep.subr.bf16.mxu0 %v4617_v5  ;;  %2117 = vmatprep.subr.bf16.mxu1 %v4620_v6  ;;  %v4710_v5 = vld [vmem:[#allocation5 + $0x5e4] ss:$16 sps:$4 sm:$0xff]   ;;  %v4713_v6 = vld [vmem:[#allocation5 + $0x5ec] ss:$16 sps:$4 sm:$0xff]  }
 0x108   : > { %1885 = vmatmul.mubr.bf16.vlgmr.msra.gmra.mrb[0].mxu0 %v4612_v7  ;;  %2097 = vmatmul.mubr.bf16.vlgmr.msra.gmra.mrb[0].mxu1 %v4612_v7  ;;  %v4708_v7 = vld [vmem:[#allocation5 + $0x5e0] ss:$16 sps:$4 sm:$0xff]  }
 0x109   : > { %1906 = vmatpush1.bf16.msra.mxu0 %v4615_v8  ;;  %2118 = vmatpush1.bf16.msra.mxu1 %v4618_v9  ;;  %v4711_v8 = vld [vmem:[#allocation5 + $0x5e8] ss:$16 sps:$4 sm:$0xff]   ;;  %v4719_v9 = vld [vmem:[#allocation5 + $0x604] ss:$16 sps:$4 sm:$0xff]  }
 0x10a   : > { %1907 = vmatprep.subr.bf16.mxu0 %v4623_v10  ;;  %2119 = vmatprep.subr.bf16.mxu1 %v4626_v11  ;;  %v4722_v10 = vld [vmem:[#allocation5 + $0x60c] ss:$16 sps:$4 sm:$0xff]  }
 0x10b   : > { %1894 = vmatprep.mubr.bf16.mxu0 %v4699_v12  ;;  %2106 = vmatprep.mubr.bf16.mxu1 %v4699_v12  ;;  %v4714_v11 = vld [vmem:[%s5435_s12 + $0x10] ss:$28 sps:$4 sm:$0xff]  }
 0x10c   : > { %v4717_v12 = vld [vmem:[#allocation5 + $0x600] ss:$16 sps:$4 sm:$0xff]  }
 0x10d   : > { %1908 = vmatpush1.bf16.msra.mxu0 %v4621_v13  ;;  %2120 = vmatpush1.bf16.msra.mxu1 %v4624_v14  ;;  %v4720_v13 = vld [vmem:[#allocation5 + $0x608] ss:$16 sps:$4 sm:$0xff]   ;;  %v4725_v14 = vld [vmem:[#allocation5 + $0x624] ss:$16 sps:$4 sm:$0xff]  }
 0x10e   : > { %1909 = vmatprep.subr.bf16.mxu0 %v4629_v15  ;;  %2121 = vmatprep.subr.bf16.mxu1 %v4632_v16  ;;  %v4728_v15 = vld [vmem:[#allocation5 + $0x62c] ss:$16 sps:$4 sm:$0xff]  }
 0x10f   : > { %v4753_v16 = vld [vmem:[%s5435_s12 + $0x4c] ss:$28 sps:$4 sm:$0xff]  }
 0x110   : > { %1895 = vmatmul.mubr.bf16.gmra.mrb[4].mxu0 %v4707_v19  ;;  %2107 = vmatmul.mubr.bf16.gmra.mrb[4].mxu1 %v4707_v19  ;;  %v4731_v19 = vld [vmem:[#allocation5 + $0x644] ss:$16 sps:$4 sm:$0xff]  }
 0x111   : > { %1910 = vmatpush1.bf16.msra.mxu0 %v4627_v17  ;;  %2122 = vmatpush1.bf16.msra.mxu1 %v4630_v18  ;;  %v4723_v17 = vld [vmem:[#allocation5 + $0x620] ss:$16 sps:$4 sm:$0xff]   ;;  %v4726_v18 = vld [vmem:[#allocation5 + $0x628] ss:$16 sps:$4 sm:$0xff]  }
 0x112   : > { %1911 = vmatprep.subr.bf16.mxu0 %v4635_v20  ;;  %2123 = vmatprep.subr.bf16.mxu1 %v4638_v21  ;;  %v4734_v20 = vld [vmem:[#allocation5 + $0x64c] ss:$16 sps:$4 sm:$0xff]   ;;  %v4755_v21 = vld [vmem:[%s5435_s12 + $0x48] ss:$28 sps:$4 sm:$0xff]  }
 0x113   : > { %1937 = vmatprep.mubr.bf16.mxu0 %v4716_v22  ;;  %2149 = vmatprep.mubr.bf16.mxu1 %v4716_v22  ;;  %v4729_v22 = vld [vmem:[#allocation5 + $0x640] ss:$16 sps:$4 sm:$0xff]  }
 0x115   : > { %1912 = vmatpush1.bf16.msra.mxu0 %v4633_v23  ;;  %2124 = vmatpush1.bf16.msra.mxu1 %v4636_v24  ;;  %v4732_v23 = vld [vmem:[#allocation5 + $0x648] ss:$16 sps:$4 sm:$0xff]   ;;  %v4737_v24 = vld [vmem:[#allocation5 + $0x664] ss:$16 sps:$4 sm:$0xff]  }
 0x116   : > { %1913 = vmatprep.subr.bf16.mxu0 %v4641_v25  ;;  %2125 = vmatprep.subr.bf16.mxu1 %v4644_v26  ;;  %v4740_v25 = vld [vmem:[#allocation5 + $0x66c] ss:$16 sps:$4 sm:$0xff]   ;;  %v4735_v26 = vld [vmem:[#allocation5 + $0x660] ss:$16 sps:$4 sm:$0xff]  }
 0x119   : > { %1914 = vmatpush1.bf16.msra.mxu0 %v4639_v27  ;;  %2126 = vmatpush1.bf16.msra.mxu1 %v4642_v28  ;;  %v4738_v27 = vld [vmem:[#allocation5 + $0x668] ss:$16 sps:$4 sm:$0xff]   ;;  %v4743_v28 = vld [vmem:[#allocation5 + $0x684] ss:$16 sps:$4 sm:$0xff]  }
 0x11a   : > { %1915 = vmatprep.subr.bf16.mxu0 %v4647_v29  ;;  %2127 = vmatprep.subr.bf16.mxu1 %v4650_v30  ;;  %v4746_v29 = vld [vmem:[#allocation5 + $0x68c] ss:$16 sps:$4 sm:$0xff]   ;;  %v4741_v30 = vld [vmem:[#allocation5 + $0x680] ss:$16 sps:$4 sm:$0xff]  }
 0x11d   : > { %1916 = vmatpush1.bf16.msra.mxu0 %v4645_v31  ;;  %2128 = vmatpush1.bf16.msra.mxu1 %v4648_v32  ;;  %v4744_v31 = vld [vmem:[#allocation5 + $0x688] ss:$16 sps:$4 sm:$0xff]   ;;  %v5194_v32 = vmov 0  }
 0x11e   : > { %1917 = vmatprep.subr.bf16.mxu0 %v4653_v33  ;;  %2129 = vmatprep.subr.bf16.mxu1 %v4656_v34  ;;  %v4749_v33 = vld [vmem:[#allocation5 + $0x6a4] ss:$16 sps:$4 sm:$0xff]   ;;  %v4752_v34 = vld [vmem:[#allocation5 + $0x6ac] ss:$16 sps:$4 sm:$0xff]  }
 0x121   : > { %1918 = vmatpush1.bf16.msra.mxu0 %v4651_v35  ;;  %2130 = vmatpush1.bf16.msra.mxu1 %v4654_v36  ;;  %v4747_v35 = vld [vmem:[#allocation5 + $0x6a0] ss:$16 sps:$4 sm:$0xff]   ;;  %v4750_v36 = vld [vmem:[#allocation5 + $0x6a8] ss:$16 sps:$4 sm:$0xff]  }
 0x122   : > { %1919 = vmatprep.subr.bf16.mxu0 %v4659_v37  ;;  %2131 = vmatprep.subr.bf16.mxu1 %v4662_v38  ;;  %v4758_v37 = vld [vmem:[#allocation5 + $0x6c4] ss:$16 sps:$4 sm:$0xff]   ;;  %v4761_v38 = vld [vmem:[#allocation5 + $0x6cc] ss:$16 sps:$4 sm:$0xff]  }
 0x125   : > { %1920 = vmatpush1.bf16.msra.mxu0 %v4657_v39  ;;  %2132 = vmatpush1.bf16.msra.mxu1 %v4660_v40  ;;  %v4756_v39 = vld [vmem:[#allocation5 + $0x6c0] ss:$16 sps:$4 sm:$0xff]   ;;  %v4759_v40 = vld [vmem:[#allocation5 + $0x6c8] ss:$16 sps:$4 sm:$0xff]  }
 0x126   : > { %1921 = vmatprep.subr.bf16.mxu0 %v4665_v41  ;;  %2133 = vmatprep.subr.bf16.mxu1 %v4668_v42  ;;  %v4764_v41 = vld [vmem:[#allocation5 + $0x6e4] ss:$16 sps:$4 sm:$0xff]   ;;  %v4767_v42 = vld [vmem:[#allocation5 + $0x6ec] ss:$16 sps:$4 sm:$0xff]  }
 0x129   : > { %1922 = vmatpush1.bf16.msra.mxu0 %v4663_v43  ;;  %2134 = vmatpush1.bf16.msra.mxu1 %v4666_v44  ;;  %v4762_v43 = vld [vmem:[#allocation5 + $0x6e0] ss:$16 sps:$4 sm:$0xff]   ;;  %v4765_v44 = vld [vmem:[#allocation5 + $0x6e8] ss:$16 sps:$4 sm:$0xff]  }
 0x12a   : > { %1923 = vmatprep.subr.bf16.mxu0 %v4671_v45  ;;  %2135 = vmatprep.subr.bf16.mxu1 %v4674_v46  ;;  %v4772_v45 = vld [vmem:[#allocation7 + $0x4] ss:$16 sps:$4 sm:$0xff]   ;;  %v4775_v46 = vld [vmem:[#allocation7 + $0xc] ss:$16 sps:$4 sm:$0xff]  }
 0x12d   : > { %1924 = vmatpush1.bf16.msra.mxu0 %v4669_v47  ;;  %2136 = vmatpush1.bf16.msra.mxu1 %v4672_v48  ;;  %v4768_v47 = vld [vmem:[%s5435_s12 + $0x18] ss:$28 sps:$4 sm:$0xff]   ;;  %v4770_v48 = vld [vmem:[#allocation7] ss:$16 sps:$4 sm:$0xff]  }
 0x12e   : > { %1925 = vmatprep.subr.bf16.mxu0 %v4677_v49  ;;  %2137 = vmatprep.subr.bf16.mxu1 %v4680_v50  ;;  %v4773_v49 = vld [vmem:[#allocation7 + $0x8] ss:$16 sps:$4 sm:$0xff]   ;;  %v4778_v50 = vld [vmem:[#allocation7 + $0x24] ss:$16 sps:$4 sm:$0xff]  }
 0x131   : > { %1926 = vmatpush1.bf16.msra.mxu0 %v4675_v51  ;;  %2138 = vmatpush1.bf16.msra.mxu1 %v4678_v52  ;;  %v4781_v51 = vld [vmem:[#allocation7 + $0x2c] ss:$16 sps:$4 sm:$0xff]   ;;  %v4776_v52 = vld [vmem:[#allocation7 + $0x20] ss:$16 sps:$4 sm:$0xff]  }
 0x132   : > { %1927 = vmatprep.subr.bf16.mxu0 %v4683_v53  ;;  %2139 = vmatprep.subr.bf16.mxu1 %v4686_v54  ;;  %v4779_v53 = vld [vmem:[#allocation7 + $0x28] ss:$16 sps:$4 sm:$0xff]   ;;  %v4784_v54 = vld [vmem:[#allocation7 + $0x44] ss:$16 sps:$4 sm:$0xff]  }
 0x135   : > { %1928 = vmatpush1.bf16.msra.mxu0 %v4681_v55  ;;  %2140 = vmatpush1.bf16.msra.mxu1 %v4684_v56  ;;  %v4787_v55 = vld [vmem:[#allocation7 + $0x4c] ss:$16 sps:$4 sm:$0xff]  }
 0x136   : > { %1929 = vmatprep.subr.bf16.mxu0 %v4689_v57  ;;  %2141 = vmatprep.subr.bf16.mxu1 %v4692_v58  ;;  %v4769_v56 = vld [vmem:[%s5435_s12 + $0x50] ss:$28 sps:$4 sm:$0xff]   ;;  %v4785_v58 = vld [vmem:[#allocation7 + $0x48] ss:$16 sps:$4 sm:$0xff]   ;;  %s3639_s12 = scalar_lea.sflag [#allocation4], %s5431_s21 }
 0x137   : > { %v4782_v57 = vld [vmem:[#allocation7 + $0x40] ss:$16 sps:$4 sm:$0xff]  }
 0x139   : > { %1930 = vmatpush1.bf16.msra.mxu0 %v4687_v59  ;;  %2142 = vmatpush1.bf16.msra.mxu1 %v4690_v60  ;;  %v4790_v59 = vld [vmem:[#allocation7 + $0x64] ss:$16 sps:$4 sm:$0xff]   ;;  %v4793_v60 = vld [vmem:[#allocation7 + $0x6c] ss:$16 sps:$4 sm:$0xff]  }
 0x13a   : > { %1931 = vmatprep.subr.bf16.mxu0 %v4695_v61  ;;  %2143 = vmatprep.subr.bf16.mxu1 %v4698_v62  ;;  %v4788_v61 = vld [vmem:[#allocation7 + $0x60] ss:$16 sps:$4 sm:$0xff]   ;;  %v4791_v62 = vld [vmem:[#allocation7 + $0x68] ss:$16 sps:$4 sm:$0xff]  }
 0x13d   : > { %1932 = vmatpush1.bf16.msra.mxu0 %v4693_v63  ;;  %2144 = vmatpush1.bf16.msra.mxu1 %v4696_v0  ;;  %v4796_v63 = vld [vmem:[#allocation7 + $0x84] ss:$16 sps:$4 sm:$0xff]   ;;  %v4799_v0 = vld [vmem:[#allocation7 + $0x8c] ss:$16 sps:$4 sm:$0xff]  }
 0x13e   : > { %1933 = vmatprep.subr.bf16.mxu0 %v4703_v1  ;;  %2145 = vmatprep.subr.bf16.mxu1 %v4706_v2  ;;  %v4794_v1 = vld [vmem:[#allocation7 + $0x80] ss:$16 sps:$4 sm:$0xff]   ;;  %v4797_v2 = vld [vmem:[#allocation7 + $0x88] ss:$16 sps:$4 sm:$0xff]  }
 0x141   : > { %1934 = vmatpush1.bf16.msra.mxu0 %v4701_v3  ;;  %2146 = vmatpush1.bf16.msra.mxu1 %v4704_v4  ;;  %v4802_v3 = vld [vmem:[#allocation7 + $0xa4] ss:$16 sps:$4 sm:$0xff]   ;;  %v4805_v4 = vld [vmem:[#allocation7 + $0xac] ss:$16 sps:$4 sm:$0xff]  }
 0x142   : > { %1935 = vmatprep.subr.bf16.mxu0 %v4710_v5  ;;  %2147 = vmatprep.subr.bf16.mxu1 %v4713_v6  ;;  %v4800_v5 = vld [vmem:[#allocation7 + $0xa0] ss:$16 sps:$4 sm:$0xff]   ;;  %v4803_v6 = vld [vmem:[#allocation7 + $0xa8] ss:$16 sps:$4 sm:$0xff]  }
 0x145   : > { %1936 = vmatpush1.bf16.msra.mxu0 %v4708_v7  ;;  %2148 = vmatpush1.bf16.msra.mxu1 %v4711_v8  ;;  %v4808_v7 = vld [vmem:[#allocation7 + $0xc4] ss:$16 sps:$4 sm:$0xff]   ;;  %v4811_v8 = vld [vmem:[#allocation7 + $0xcc] ss:$16 sps:$4 sm:$0xff]  }
 0x146   : > { %1958 = vmatprep.subr.bf16.mxu0 %v4719_v9  ;;  %2170 = vmatprep.subr.bf16.mxu1 %v4722_v10  ;;  %v4806_v9 = vld [vmem:[#allocation7 + $0xc0] ss:$16 sps:$4 sm:$0xff]   ;;  %v4809_v10 = vld [vmem:[#allocation7 + $0xc8] ss:$16 sps:$4 sm:$0xff]  }
 0x148   : > { %1938 = vmatmul.mubr.bf16.vlgmr.msra.gmra.mrb[0].mxu0 %v4714_v11  ;;  %2150 = vmatmul.mubr.bf16.vlgmr.msra.gmra.mrb[0].mxu1 %v4714_v11  ;;  %v4814_v11 = vld [vmem:[#allocation7 + $0xe4] ss:$16 sps:$4 sm:$0xff]  }
 0x149   : > { %1959 = vmatpush1.bf16.msra.mxu0 %v4717_v12  ;;  %2171 = vmatpush1.bf16.msra.mxu1 %v4720_v13  ;;  %v4817_v12 = vld [vmem:[#allocation7 + $0xec] ss:$16 sps:$4 sm:$0xff]   ;;  %v4812_v13 = vld [vmem:[#allocation7 + $0xe0] ss:$16 sps:$4 sm:$0xff]  }
 0x14a   : > { %1960 = vmatprep.subr.bf16.mxu0 %v4725_v14  ;;  %2172 = vmatprep.subr.bf16.mxu1 %v4728_v15  ;;  %v4815_v14 = vld [vmem:[#allocation7 + $0xe8] ss:$16 sps:$4 sm:$0xff]   ;;  %v4820_v15 = vld [vmem:[#allocation7 + $0x104] ss:$16 sps:$4 sm:$0xff]  }
 0x14b   : > { %1947 = vmatprep.mubr.bf16.mxu0 %v4753_v16  ;;  %2159 = vmatprep.mubr.bf16.mxu1 %v4753_v16  ;;  %v4823_v16 = vld [vmem:[#allocation7 + $0x10c] ss:$16 sps:$4 sm:$0xff]  }
 0x14d   : > { %1961 = vmatpush1.bf16.msra.mxu0 %v4723_v17  ;;  %2173 = vmatpush1.bf16.msra.mxu1 %v4726_v18  ;;  %v4818_v17 = vld [vmem:[#allocation7 + $0x100] ss:$16 sps:$4 sm:$0xff]   ;;  %v4821_v18 = vld [vmem:[#allocation7 + $0x108] ss:$16 sps:$4 sm:$0xff]  }
 0x14e   : > { %1962 = vmatprep.subr.bf16.mxu0 %v4731_v19  ;;  %2174 = vmatprep.subr.bf16.mxu1 %v4734_v20  ;;  %v4826_v19 = vld [vmem:[#allocation7 + $0x124] ss:$16 sps:$4 sm:$0xff]   ;;  %v4829_v20 = vld [vmem:[#allocation7 + $0x12c] ss:$16 sps:$4 sm:$0xff]  }
 0x150   : > { %1948 = vmatmul.mubr.bf16.gmra.mrb[4].mxu0 %v4755_v21  ;;  %2160 = vmatmul.mubr.bf16.gmra.mrb[4].mxu1 %v4755_v21  ;;  %v4824_v21 = vld [vmem:[#allocation7 + $0x120] ss:$16 sps:$4 sm:$0xff]  }
 0x151   : > { %1963 = vmatpush1.bf16.msra.mxu0 %v4729_v22  ;;  %2175 = vmatpush1.bf16.msra.mxu1 %v4732_v23  ;;  %v4827_v22 = vld [vmem:[#allocation7 + $0x128] ss:$16 sps:$4 sm:$0xff]   ;;  %v4832_v23 = vld [vmem:[#allocation7 + $0x144] ss:$16 sps:$4 sm:$0xff]  }
 0x152   : > { %1964 = vmatprep.subr.bf16.mxu0 %v4737_v24  ;;  %2176 = vmatprep.subr.bf16.mxu1 %v4740_v25  ;;  %v4835_v24 = vld [vmem:[#allocation7 + $0x14c] ss:$16 sps:$4 sm:$0xff]   ;;  %v4830_v25 = vld [vmem:[#allocation7 + $0x140] ss:$16 sps:$4 sm:$0xff]  }
 0x153   : > { %1990 = vmatprep.mubr.bf16.mxu0 %v5194_v32  ;;  %2202 = vmatprep.mubr.bf16.mxu1 %v5194_v32 }
 0x155   : > { %1965 = vmatpush1.bf16.msra.mxu0 %v4735_v26  ;;  %2177 = vmatpush1.bf16.msra.mxu1 %v4738_v27  ;;  %v4833_v26 = vld [vmem:[#allocation7 + $0x148] ss:$16 sps:$4 sm:$0xff]   ;;  %v4838_v27 = vld [vmem:[#allocation7 + $0x164] ss:$16 sps:$4 sm:$0xff]  }
 0x156   : > { %1966 = vmatprep.subr.bf16.mxu0 %v4743_v28  ;;  %2178 = vmatprep.subr.bf16.mxu1 %v4746_v29  ;;  %v4841_v28 = vld [vmem:[#allocation7 + $0x16c] ss:$16 sps:$4 sm:$0xff]   ;;  %v4836_v29 = vld [vmem:[#allocation7 + $0x160] ss:$16 sps:$4 sm:$0xff]  }
 0x159   : > { %1967 = vmatpush1.bf16.msra.mxu0 %v4741_v30  ;;  %2179 = vmatpush1.bf16.msra.mxu1 %v4744_v31  ;;  %v4839_v30 = vld [vmem:[#allocation7 + $0x168] ss:$16 sps:$4 sm:$0xff]   ;;  %v4844_v31 = vld [vmem:[#allocation7 + $0x184] ss:$16 sps:$4 sm:$0xff]  }
 0x15a   : > { %1968 = vmatprep.subr.bf16.mxu0 %v4749_v33  ;;  %2180 = vmatprep.subr.bf16.mxu1 %v4752_v34  ;;  %v4842_v33 = vld [vmem:[#allocation7 + $0x180] ss:$16 sps:$4 sm:$0xff]   ;;  %v4845_v34 = vld [vmem:[#allocation7 + $0x188] ss:$16 sps:$4 sm:$0xff]  }
 0x15d   : > { %1969 = vmatpush1.bf16.msra.mxu0 %v4747_v35  ;;  %2181 = vmatpush1.bf16.msra.mxu1 %v4750_v36  ;;  %v4850_v35 = vld [vmem:[#allocation7 + $0x1a4] ss:$16 sps:$4 sm:$0xff]   ;;  %v4853_v36 = vld [vmem:[#allocation7 + $0x1ac] ss:$16 sps:$4 sm:$0xff]  }
 0x15e   : > { %1970 = vmatprep.subr.bf16.mxu0 %v4758_v37  ;;  %2182 = vmatprep.subr.bf16.mxu1 %v4761_v38  ;;  %v4848_v37 = vld [vmem:[#allocation7 + $0x1a0] ss:$16 sps:$4 sm:$0xff]   ;;  %v4851_v38 = vld [vmem:[#allocation7 + $0x1a8] ss:$16 sps:$4 sm:$0xff]  }
 0x161   : > { %1971 = vmatpush1.bf16.msra.mxu0 %v4756_v39  ;;  %2183 = vmatpush1.bf16.msra.mxu1 %v4759_v40  ;;  %v4856_v39 = vld [vmem:[#allocation7 + $0x1c4] ss:$16 sps:$4 sm:$0xff]   ;;  %v4859_v40 = vld [vmem:[#allocation7 + $0x1cc] ss:$16 sps:$4 sm:$0xff]  }
 0x162   : > { %1972 = vmatprep.subr.bf16.mxu0 %v4764_v41  ;;  %2184 = vmatprep.subr.bf16.mxu1 %v4767_v42  ;;  %v4854_v41 = vld [vmem:[#allocation7 + $0x1c0] ss:$16 sps:$4 sm:$0xff]   ;;  %v4857_v42 = vld [vmem:[#allocation7 + $0x1c8] ss:$16 sps:$4 sm:$0xff]  }
 0x165   : > { %1973 = vmatpush1.bf16.msra.mxu0 %v4762_v43  ;;  %2185 = vmatpush1.bf16.msra.mxu1 %v4765_v44  ;;  %v4862_v43 = vld [vmem:[#allocation7 + $0x1e4] ss:$16 sps:$4 sm:$0xff]   ;;  %v4865_v44 = vld [vmem:[#allocation7 + $0x1ec] ss:$16 sps:$4 sm:$0xff]  }
 0x166   : > { %3037 = vmatprep.subr.bf16.mxu0 %v4772_v45  ;;  %3143 = vmatprep.subr.bf16.mxu1 %v4775_v46  ;;  %v4860_v45 = vld [vmem:[#allocation7 + $0x1e0] ss:$16 sps:$4 sm:$0xff]   ;;  %v4863_v46 = vld [vmem:[#allocation7 + $0x1e8] ss:$16 sps:$4 sm:$0xff]  }
 0x168   : > { %1991 = vmatmul.mubr.bf16.vlgmr.msra.gmra.mrb[0].mxu0 %v4768_v47  ;;  %2203 = vmatmul.mubr.bf16.vlgmr.msra.gmra.mrb[0].mxu1 %v4768_v47  ;;  %v4868_v47 = vld [vmem:[#allocation7 + $0x204] ss:$16 sps:$4 sm:$0xff]  }
 0x169   : > { %2000 = vmatprep.mubr.bf16.mxu0 %v5194_v32  ;;  %2212 = vmatprep.mubr.bf16.mxu1 %v5194_v32  ;;  %v4847_v32 = vld [vmem:[#allocation7 + $0x18c] ss:$16 sps:$4 sm:$0xff]  }
 0x16a   : > { %3038 = vmatpush1.bf16.msra.mxu0 %v4770_v48  ;;  %3144 = vmatpush1.bf16.msra.mxu1 %v4773_v49  ;;  %v4871_v48 = vld [vmem:[#allocation7 + $0x20c] ss:$16 sps:$4 sm:$0xff]   ;;  %v587_v49 = vlaneseq }
 0x16b   : > { %3039 = vmatprep.subr.bf16.mxu0 %v4778_v50  ;;  %3145 = vmatprep.subr.bf16.mxu1 %v4781_v51 }
 0x16c   : > { %v5463_v50 = vshrl.u32 %v587_v49, 7 }
 0x16e   : > { %3040 = vmatpush1.bf16.msra.mxu0 %v4776_v52  ;;  %3146 = vmatpush1.bf16.msra.mxu1 %v4779_v53  ;;  %v589_v51 = vsub.s32 0, %v5463_v50  ;;  %v597_v52 = vsub.s32 2, %v5463_v50  ;;  %v585_v53 = vld [vmem:[%s5559_s2] sm:$0xf] }
 0x16f   : > { %3041 = vmatprep.subr.bf16.mxu0 %v4784_v54  ;;  %3147 = vmatprep.subr.bf16.mxu1 %v4787_v55  ;;  %v593_v54 = vsub.s32 1, %v5463_v50  ;;  %v601_v55 = vsub.s32 3, %v5463_v50 }
 0x170   : > { %2001 = vmatmul.mubr.bf16.gmra.mrb[4].mxu0 %v4769_v56  ;;  %2213 = vmatmul.mubr.bf16.gmra.mrb[4].mxu1 %v4769_v56  ;;  %v590_v56 = vrot.slane %v585_v53, %v589_v51 }
 0x172   : > { %3042 = vmatpush1.bf16.msra.mxu0 %v4782_v57  ;;  %3148 = vmatpush1.bf16.msra.mxu1 %v4785_v58  ;;  %v598_v57 = vrot.slane %v585_v53, %v597_v52  ;;  %v594_v58 = vrot.slane %v585_v53, %v593_v54 }
 0x173   : > { %3043 = vmatprep.subr.bf16.mxu0 %v4790_v59  ;;  %3149 = vmatprep.subr.bf16.mxu1 %v4793_v60  ;;  %v602_v59 = vrot.slane %v585_v53, %v601_v55 }
 0x176   : > { %3044 = vmatpush1.bf16.msra.mxu0 %v4788_v61  ;;  %3150 = vmatpush1.bf16.msra.mxu1 %v4791_v62 }
 0x177   : > { %3045 = vmatprep.subr.bf16.mxu0 %v4796_v63  ;;  %3151 = vmatprep.subr.bf16.mxu1 %v4799_v0 }
 0x17a   : > { %3046 = vmatpush1.bf16.msra.mxu0 %v4794_v1  ;;  %3152 = vmatpush1.bf16.msra.mxu1 %v4797_v2 }
 0x17b   : > { %3047 = vmatprep.subr.bf16.mxu0 %v4802_v3  ;;  %3153 = vmatprep.subr.bf16.mxu1 %v4805_v4 }
 0x17e   : > { %3048 = vmatpush1.bf16.msra.mxu0 %v4800_v5  ;;  %3154 = vmatpush1.bf16.msra.mxu1 %v4803_v6 }
 0x17f   : > { %3049 = vmatprep.subr.bf16.mxu0 %v4808_v7  ;;  %3155 = vmatprep.subr.bf16.mxu1 %v4811_v8 }
 0x182   : > { %3050 = vmatpush1.bf16.msra.mxu0 %v4806_v9  ;;  %3156 = vmatpush1.bf16.msra.mxu1 %v4809_v10 }
 0x183   : > { %3051 = vmatprep.subr.bf16.mxu0 %v4814_v11  ;;  %3157 = vmatprep.subr.bf16.mxu1 %v4817_v12 }
 0x186   : > { %3052 = vmatpush1.bf16.msra.mxu0 %v4812_v13  ;;  %3158 = vmatpush1.bf16.msra.mxu1 %v4815_v14 }
 0x187   : > { %3053 = vmatprep.subr.bf16.mxu0 %v4820_v15  ;;  %3159 = vmatprep.subr.bf16.mxu1 %v4823_v16 }
 0x18a   : > { %3054 = vmatpush1.bf16.msra.mxu0 %v4818_v17  ;;  %3160 = vmatpush1.bf16.msra.mxu1 %v4821_v18 }
 0x18b   : > { %3055 = vmatprep.subr.bf16.mxu0 %v4826_v19  ;;  %3161 = vmatprep.subr.bf16.mxu1 %v4829_v20 }
 0x18e   : > { %3056 = vmatpush1.bf16.msra.mxu0 %v4824_v21  ;;  %3162 = vmatpush1.bf16.msra.mxu1 %v4827_v22 }
 0x18f   : > { %3057 = vmatprep.subr.bf16.mxu0 %v4832_v23  ;;  %3163 = vmatprep.subr.bf16.mxu1 %v4835_v24 }
 0x192   : > { %3058 = vmatpush1.bf16.msra.mxu0 %v4830_v25  ;;  %3164 = vmatpush1.bf16.msra.mxu1 %v4833_v26  ;;  %v4866_v26 = vld [vmem:[#allocation7 + $0x200] ss:$16 sps:$4 sm:$0xff]  }
 0x193   : > { %3059 = vmatprep.subr.bf16.mxu0 %v4838_v27  ;;  %3165 = vmatprep.subr.bf16.mxu1 %v4841_v28  ;;  %v4869_v27 = vld [vmem:[#allocation7 + $0x208] ss:$16 sps:$4 sm:$0xff]  }
 0x196   : > { %3060 = vmatpush1.bf16.msra.mxu0 %v4836_v29  ;;  %3166 = vmatpush1.bf16.msra.mxu1 %v4839_v30 }
 0x197   : > { %3061 = vmatprep.subr.bf16.mxu0 %v4844_v31  ;;  %3167 = vmatprep.subr.bf16.mxu1 %v4847_v32  ;;  %v4874_v32 = vld [vmem:[#allocation7 + $0x224] ss:$16 sps:$4 sm:$0xff]  }
 0x19a   : > { %3062 = vmatpush1.bf16.msra.mxu0 %v4842_v33  ;;  %3168 = vmatpush1.bf16.msra.mxu1 %v4845_v34  ;;  %v4877_v33 = vld [vmem:[#allocation7 + $0x22c] ss:$16 sps:$4 sm:$0xff]  }
 0x19b   : > { %3063 = vmatprep.subr.bf16.mxu0 %v4850_v35  ;;  %3169 = vmatprep.subr.bf16.mxu1 %v4853_v36 }
 0x19e   : > { %3064 = vmatpush1.bf16.msra.mxu0 %v4848_v37  ;;  %3170 = vmatpush1.bf16.msra.mxu1 %v4851_v38 }
 0x19f   : > { %3065 = vmatprep.subr.bf16.mxu0 %v4856_v39  ;;  %3171 = vmatprep.subr.bf16.mxu1 %v4859_v40 }
 0x1a2   : > { %3066 = vmatpush1.bf16.msra.mxu0 %v4854_v41  ;;  %3172 = vmatpush1.bf16.msra.mxu1 %v4857_v42 }
 0x1a3   : > { %3067 = vmatprep.subr.bf16.mxu0 %v4862_v43  ;;  %3173 = vmatprep.subr.bf16.mxu1 %v4865_v44  ;;  %v4872_v44 = vld [vmem:[#allocation7 + $0x220] ss:$16 sps:$4 sm:$0xff]  }
 0x1a6   : > { %3068 = vmatpush1.bf16.msra.mxu0 %v4860_v45  ;;  %3174 = vmatpush1.bf16.msra.mxu1 %v4863_v46  ;;  %v4875_v45 = vld [vmem:[#allocation7 + $0x228] ss:$16 sps:$4 sm:$0xff]   ;;  %v4880_v46 = vld [vmem:[#allocation7 + $0x244] ss:$16 sps:$4 sm:$0xff]  }
 0x1a7   : > { %3090 = vmatprep.subr.bf16.mxu0 %v4868_v47  ;;  %3196 = vmatprep.subr.bf16.mxu1 %v4871_v48 }
 0x23b   : > { %v1992_v60 = vpop.f32.mrb[0].mxu0  ;;  %v2204_v61 = vpop.f32.mrb[0].mxu1 }
 0x23c   : > { %v4229_v62 = vadd.f32 %v1992_v60, %v590_v56  ;;  %v4237_v63 = vadd.f32 %v2204_v61, %v598_v57  ;;  %v1994_v0 = vpop.f32.mrb[1].mxu0  ;;  %v2206_v1 = vpop.f32.mrb[1].mxu1  ;;  %v4883_v60 = vld [vmem:[#allocation7 + $0x24c] ss:$16 sps:$4 sm:$0xff]  }
 0x23d   : > { %v4230_v2 = vadd.f32 %v1994_v0, %v594_v58  ;;  %v4238_v3 = vadd.f32 %v2206_v1, %v602_v59  ;;  %v1996_v4 = vpop.f32.mrb[2].mxu0  ;;  %v2208_v5 = vpop.f32.mrb[2].mxu1  ;;  %v4878_v1 = vld [vmem:[#allocation7 + $0x240] ss:$16 sps:$4 sm:$0xff]  }
 0x23e   : > { %v4231_v6 = vadd.f32 %v1996_v4, %v590_v56  ;;  %v4239_v7 = vadd.f32 %v2208_v5, %v598_v57  ;;  %v1998_v8 = vpop.f32.mrb[3].mxu0  ;;  %v2210_v9 = vpop.f32.mrb[3].mxu1  ;;  %v2223_v12 = vmax.f32 %v4229_v62, 0.0  ;;  %v2225_v13 = vmax.f32 %v4237_v63, 0.0  ;;  %v4889_v4 = vld [vmem:[#allocation7 + $0x26c] ss:$16 sps:$4 sm:$0xff]  }
 0x23f   : > { %v4232_v10 = vadd.f32 %v1998_v8, %v594_v58  ;;  %v4240_v11 = vadd.f32 %v2210_v9, %v602_v59  ;;  %v2224_v16 = vmax.f32 %v4230_v2, 0.0  ;;  %v2226_v17 = vmax.f32 %v4238_v3, 0.0  ;;  %v4881_v2 = vld [vmem:[#allocation7 + $0x248] ss:$16 sps:$4 sm:$0xff]   ;;  %v4886_v3 = vld [vmem:[#allocation7 + $0x264] ss:$16 sps:$4 sm:$0xff]  }
 0x240   : > { %v2227_v14 = vmax.f32 %v4231_v6, 0.0  ;;  %v2229_v15 = vmax.f32 %v4239_v7, 0.0  ;;  %v4884_v5 = vld [vmem:[#allocation7 + $0x260] ss:$16 sps:$4 sm:$0xff]   ;;  %v4887_v6 = vld [vmem:[#allocation7 + $0x268] ss:$16 sps:$4 sm:$0xff]  }
 0x241   : > { %v2228_v18 = vmax.f32 %v4232_v10, 0.0  ;;  %v2230_v19 = vmax.f32 %v4240_v11, 0.0  ;;  %v4892_v7 = vld [vmem:[#allocation7 + $0x284] ss:$16 sps:$4 sm:$0xff]   ;;  %v4895_v8 = vld [vmem:[#allocation7 + $0x28c] ss:$16 sps:$4 sm:$0xff]  }
 0x242   : > { %v2239_v20 = vpack.c.bf16 %v2227_v14, %v2223_v12  ;;  %v5480_v21 = vpack.c.bf16 %v2229_v15, %v2225_v13  ;;  %v4890_v9 = vld [vmem:[#allocation7 + $0x280] ss:$16 sps:$4 sm:$0xff]   ;;  %v4893_v10 = vld [vmem:[#allocation7 + $0x288] ss:$16 sps:$4 sm:$0xff]   ;;  %v4898_v11 = vld [vmem:[#allocation7 + $0x2a4] ss:$16 sps:$4 sm:$0xff]  }
 0x243   : > { %v2240_v22 = vpack.c.bf16 %v2228_v18, %v2224_v16  ;;  %v2242_v23 = vpack.c.bf16 %v2230_v19, %v2226_v17  ;;  %v2002_v24 = vpop.f32.mrb[4].mxu0  ;;  %v2214_v25 = vpop.f32.mrb[4].mxu1  ;;  %v4901_v12 = vld [vmem:[#allocation7 + $0x2ac] ss:$16 sps:$4 sm:$0xff]   ;;  %v4896_v13 = vld [vmem:[#allocation7 + $0x2a0] ss:$16 sps:$4 sm:$0xff]  }
 0x244   : > { %v4233_v28 = vadd.f32 %v2002_v24, %v590_v56  ;;  %v4241_v29 = vadd.f32 %v2214_v25, %v598_v57  ;;  %v2004_v30 = vpop.f32.mrb[5].mxu0  ;;  %v2216_v31 = vpop.f32.mrb[5].mxu1  ;;  %v4899_v14 = vld [vmem:[#allocation7 + $0x2a8] ss:$16 sps:$4 sm:$0xff]   ;;  %v4904_v15 = vld [vmem:[#allocation7 + $0x2c4] ss:$16 sps:$4 sm:$0xff]  }
 0x245   : > { %v4234_v34 = vadd.f32 %v2004_v30, %v594_v58  ;;  %v4242_v35 = vadd.f32 %v2216_v31, %v602_v59  ;;  %v2006_v36 = vpop.f32.mrb[6].mxu0  ;;  %v2218_v37 = vpop.f32.mrb[6].mxu1  ;;  %3069 = vmatprep.mubr.bf16.mxu0 %v2240_v22  ;;  %3175 = vmatprep.mubr.bf16.mxu1 %v2240_v22  ;;  %v4907_v16 = vld [vmem:[#allocation7 + $0x2cc] ss:$16 sps:$4 sm:$0xff]   ;;  %v4902_v17 = vld [vmem:[#allocation7 + $0x2c0] ss:$16 sps:$4 sm:$0xff]  }
 0x246   : > { %v4235_v38 = vadd.f32 %v2006_v36, %v590_v56  ;;  %v4243_v39 = vadd.f32 %v2218_v37, %v598_v57  ;;  %v2008_v40 = vpop.f32.mrb[7].mxu0  ;;  %v2220_v41 = vpop.f32.mrb[7].mxu1  ;;  %3070 = vmatmul.mubr.bf16.vlgmr.msra.gmra.mrb[8].mxu0 %v2239_v20  ;;  %3176 = vmatmul.mubr.bf16.vlgmr.msra.gmra.mrb[8].mxu1 %v2239_v20  ;;  %v2231_v47 = vmax.f32 %v4233_v28, 0.0  ;;  %v2233_v48 = vmax.f32 %v4241_v29, 0.0  ;;  %v4905_v18 = vld [vmem:[#allocation7 + $0x2c8] ss:$16 sps:$4 sm:$0xff]  }
 0x247   : > { %v4236_v42 = vadd.f32 %v2008_v40, %v594_v58  ;;  %v4244_v43 = vadd.f32 %v2220_v41, %v602_v59  ;;  %3091 = vmatpush1.bf16.msra.mxu0 %v4866_v26  ;;  %3197 = vmatpush1.bf16.msra.mxu1 %v4869_v27  ;;  %v2232_v56 = vmax.f32 %v4234_v34, 0.0  ;;  %v2234_v57 = vmax.f32 %v4242_v35, 0.0  ;;  %v4910_v19 = vld [vmem:[#allocation7 + $0x2e4] ss:$16 sps:$4 sm:$0xff]   ;;  %v4913_v20 = vld [vmem:[#allocation7 + $0x2ec] ss:$16 sps:$4 sm:$0xff]  }
 0x248   : > { %v2235_v49 = vmax.f32 %v4235_v38, 0.0  ;;  %v2237_v53 = vmax.f32 %v4243_v39, 0.0  ;;  %3092 = vmatprep.subr.bf16.mxu0 %v4874_v32  ;;  %3198 = vmatprep.subr.bf16.mxu1 %v4877_v33  ;;  %v4908_v22 = vld [vmem:[#allocation7 + $0x2e0] ss:$16 sps:$4 sm:$0xff]   ;;  %v4916_v24 = vld [vmem:[#allocation7 + $0x304] ss:$16 sps:$4 sm:$0xff]  }
 0x249   : > { %v2236_v61 = vmax.f32 %v4236_v42, 0.0  ;;  %v2238_v62 = vmax.f32 %v4244_v43, 0.0  ;;  %v4919_v25 = vld [vmem:[#allocation7 + $0x30c] ss:$16 sps:$4 sm:$0xff]   ;;  %v4914_v26 = vld [vmem:[#allocation7 + $0x300] ss:$16 sps:$4 sm:$0xff]  }
 0x24a   : > { %v2243_v63 = vpack.c.bf16 %v2235_v49, %v2231_v47  ;;  %v5482_v0 = vpack.c.bf16 %v2237_v53, %v2233_v48  ;;  %v4917_v27 = vld [vmem:[#allocation7 + $0x308] ss:$16 sps:$4 sm:$0xff]   ;;  %v4922_v28 = vld [vmem:[#allocation7 + $0x324] ss:$16 sps:$4 sm:$0xff]   ;;  %v4925_v29 = vld [vmem:[#allocation7 + $0x32c] ss:$16 sps:$4 sm:$0xff]  }
 0x24b   : > { %v2244_v58 = vpack.c.bf16 %v2236_v61, %v2232_v56  ;;  %v5484_v59 = vpack.c.bf16 %v2238_v62, %v2234_v57  ;;  %3093 = vmatpush1.bf16.msra.mxu0 %v4872_v44  ;;  %3199 = vmatpush1.bf16.msra.mxu1 %v4875_v45  ;;  %v4920_v30 = vld [vmem:[#allocation7 + $0x320] ss:$16 sps:$4 sm:$0xff]   ;;  %v4923_v31 = vld [vmem:[#allocation7 + $0x328] ss:$16 sps:$4 sm:$0xff]   ;;  %v4928_v32 = vld [vmem:[#allocation7 + $0x344] ss:$16 sps:$4 sm:$0xff]  }
 0x24c   : > { %3094 = vmatprep.subr.bf16.mxu0 %v4880_v46  ;;  %3200 = vmatprep.subr.bf16.mxu1 %v4883_v60  ;;  %v4931_v33 = vld [vmem:[#allocation7 + $0x34c] ss:$16 sps:$4 sm:$0xff]   ;;  %v4926_v34 = vld [vmem:[#allocation7 + $0x340] ss:$16 sps:$4 sm:$0xff]   ;;  %v4929_v35 = vld [vmem:[#allocation7 + $0x348] ss:$16 sps:$4 sm:$0xff]  }
 0x24d   : > { %3079 = vmatprep.mubr.bf16.mxu0 %v2244_v58  ;;  %3185 = vmatprep.mubr.bf16.mxu1 %v2244_v58  ;;  %v4934_v36 = vld [vmem:[#allocation7 + $0x364] ss:$16 sps:$4 sm:$0xff]   ;;  %v4937_v37 = vld [vmem:[#allocation7 + $0x36c] ss:$16 sps:$4 sm:$0xff]   ;;  %v4932_v38 = vld [vmem:[#allocation7 + $0x360] ss:$16 sps:$4 sm:$0xff]  }
 0x24e   : > { %3080 = vmatmul.mubr.bf16.gmra.mrb[12].mxu0 %v2243_v63  ;;  %3186 = vmatmul.mubr.bf16.gmra.mrb[12].mxu1 %v2243_v63  ;;  %v4935_v39 = vld [vmem:[#allocation7 + $0x368] ss:$16 sps:$4 sm:$0xff]   ;;  %v4940_v40 = vld [vmem:[#allocation7 + $0x384] ss:$16 sps:$4 sm:$0xff]   ;;  %v4943_v41 = vld [vmem:[#allocation7 + $0x38c] ss:$16 sps:$4 sm:$0xff]  }
 0x24f   : > { %3095 = vmatpush1.bf16.msra.mxu0 %v4878_v1  ;;  %3201 = vmatpush1.bf16.msra.mxu1 %v4881_v2  ;;  %v4938_v42 = vld [vmem:[#allocation7 + $0x380] ss:$16 sps:$4 sm:$0xff]   ;;  %v4941_v43 = vld [vmem:[#allocation7 + $0x388] ss:$16 sps:$4 sm:$0xff]   ;;  %v4946_v44 = vld [vmem:[#allocation7 + $0x3a4] ss:$16 sps:$4 sm:$0xff]  }
 0x250   : > { %3122 = vmatprep.mubr.bf16.mxu0 %v2242_v23  ;;  %3228 = vmatprep.mubr.bf16.mxu1 %v2242_v23  ;;  %v4911_v23 = vld [vmem:[#allocation7 + $0x2e8] ss:$16 sps:$4 sm:$0xff]   ;;  %v4949_v45 = vld [vmem:[#allocation7 + $0x3ac] ss:$16 sps:$4 sm:$0xff]   ;;  %v4944_v46 = vld [vmem:[#allocation7 + $0x3a0] ss:$16 sps:$4 sm:$0xff]  }
 0x251   : > { %3096 = vmatprep.subr.bf16.mxu0 %v4886_v3  ;;  %3202 = vmatprep.subr.bf16.mxu1 %v4889_v4  ;;  %v4947_v47 = vld [vmem:[#allocation7 + $0x3a8] ss:$16 sps:$4 sm:$0xff]   ;;  %v4952_v48 = vld [vmem:[#allocation7 + $0x3c4] ss:$16 sps:$4 sm:$0xff]   ;;  %v4955_v49 = vld [vmem:[#allocation7 + $0x3cc] ss:$16 sps:$4 sm:$0xff]  }
 0x252   : > { %v4950_v53 = vld [vmem:[#allocation7 + $0x3c0] ss:$16 sps:$4 sm:$0xff]   ;;  %v4953_v60 = vld [vmem:[#allocation7 + $0x3c8] ss:$16 sps:$4 sm:$0xff]   ;;  %v4958_v56 = vld [vmem:[#allocation7 + $0x3e4] ss:$16 sps:$4 sm:$0xff]  }
 0x253   : > { %3097 = vmatpush1.bf16.msra.mxu0 %v4884_v5  ;;  %3203 = vmatpush1.bf16.msra.mxu1 %v4887_v6  ;;  %v4961_v57 = vld [vmem:[#allocation7 + $0x3ec] ss:$16 sps:$4 sm:$0xff]   ;;  %v4956_v61 = vld [vmem:[#allocation7 + $0x3e0] ss:$16 sps:$4 sm:$0xff]   ;;  %v4959_v62 = vld [vmem:[#allocation7 + $0x3e8] ss:$16 sps:$4 sm:$0xff]  }
 0x254   : > { %3098 = vmatprep.subr.bf16.mxu0 %v4892_v7  ;;  %3204 = vmatprep.subr.bf16.mxu1 %v4895_v8  ;;  %v4962_v63 = vld [vmem:[#allocation8 + $0x40] sm:$0xff]   ;;  %v4966_v3 = vld [vmem:[#allocation8 + $0x48] sm:$0xff]   ;;  %v4970_v7 = vld [vmem:[#allocation8 + $0x50] sm:$0xff]  }
 0x255   : > { %v4963_v58 = vld [vmem:[#allocation8 + $0xc0] sm:$0xff]   ;;  %v4967_v4 = vld [vmem:[#allocation8 + $0xc8] sm:$0xff]   ;;  %v4971_v8 = vld [vmem:[#allocation8 + $0xd0] sm:$0xff]  }
 0x256   : > { %v4964_v1 = vld [vmem:[#allocation8] sm:$0xff]   ;;  %v4968_v5 = vld [vmem:[#allocation8 + $0x8] sm:$0xff]  }
 0x257   : > { %3099 = vmatpush1.bf16.msra.mxu0 %v4890_v9  ;;  %3205 = vmatpush1.bf16.msra.mxu1 %v4893_v10  ;;  %v4965_v2 = vld [vmem:[#allocation8 + $0x80] sm:$0xff]   ;;  %v4969_v6 = vld [vmem:[#allocation8 + $0x88] sm:$0xff]   ;;  %v4972_v9 = vld [vmem:[#allocation8 + $0x10] sm:$0xff]  }
 0x258   : > { %3100 = vmatprep.subr.bf16.mxu0 %v4898_v11  ;;  %3206 = vmatprep.subr.bf16.mxu1 %v4901_v12  ;;  %v4973_v10 = vld [vmem:[#allocation8 + $0x90] sm:$0xff]   ;;  %v4974_v11 = vld [vmem:[#allocation8 + $0x58] sm:$0xff]  }
 0x259   : > { %v4977_v12 = vld [vmem:[#allocation8 + $0x98] sm:$0xff]  }
 0x25b   : > { %3101 = vmatpush1.bf16.msra.mxu0 %v4896_v13  ;;  %3207 = vmatpush1.bf16.msra.mxu1 %v4899_v14  ;;  %v4978_v13 = vld [vmem:[#allocation8 + $0x60] sm:$0xff]  }
 0x25c   : > { %3102 = vmatprep.subr.bf16.mxu0 %v4904_v15  ;;  %3208 = vmatprep.subr.bf16.mxu1 %v4907_v16  ;;  %v4979_v14 = vld [vmem:[#allocation8 + $0xe0] sm:$0xff]  }
 0x25d   : > { %v4980_v15 = vld [vmem:[#allocation8 + $0x20] sm:$0xff]  }
 0x25e   : > { %v4981_v16 = vld [vmem:[#allocation8 + $0xa0] sm:$0xff]  }
 0x25f   : > { %3103 = vmatpush1.bf16.msra.mxu0 %v4902_v17  ;;  %3209 = vmatpush1.bf16.msra.mxu1 %v4905_v18  ;;  %v4982_v17 = vld [vmem:[#allocation8 + $0x68] sm:$0xff]  }
 0x260   : > { %3104 = vmatprep.subr.bf16.mxu0 %v4910_v19  ;;  %3210 = vmatprep.subr.bf16.mxu1 %v4913_v20  ;;  %v4983_v18 = vld [vmem:[#allocation8 + $0xe8] sm:$0xff]   ;;  %v4986_v20 = vld [vmem:[#allocation8 + $0x70] sm:$0xff]  }
 0x261   : > { %v4985_v19 = vld [vmem:[#allocation8 + $0xa8] sm:$0xff]  }
 0x263   : > { %3105 = vmatpush1.bf16.msra.mxu0 %v4908_v22  ;;  %3211 = vmatpush1.bf16.msra.mxu1 %v4911_v23  ;;  %v4987_v22 = vld [vmem:[#allocation8 + $0xf0] sm:$0xff]  }
 0x264   : > { %3106 = vmatprep.subr.bf16.mxu0 %v4916_v24  ;;  %3212 = vmatprep.subr.bf16.mxu1 %v4919_v25  ;;  %v4988_v23 = vld [vmem:[#allocation8 + $0x30] sm:$0xff]   ;;  %v4990_v25 = vld [vmem:[#allocation8 + $0x78] sm:$0xff]  }
 0x265   : > { %v4989_v24 = vld [vmem:[#allocation8 + $0xb0] sm:$0xff]  }
 0x267   : > { %3107 = vmatpush1.bf16.msra.mxu0 %v4914_v26  ;;  %3213 = vmatpush1.bf16.msra.mxu1 %v4917_v27  ;;  %v4991_v26 = vld [vmem:[#allocation8 + $0xf8] sm:$0xff]  }
 0x268   : > { %3108 = vmatprep.subr.bf16.mxu0 %v4922_v28  ;;  %3214 = vmatprep.subr.bf16.mxu1 %v4925_v29  ;;  %v4992_v27 = vld [vmem:[#allocation8 + $0x38] sm:$0xff]   ;;  %v2375_v29 = vld [vmem:[%s5561_s4] sm:$0xf] }
 0x269   : > { %v4993_v28 = vld [vmem:[#allocation8 + $0xb8] sm:$0xff]  }
 0x26b   : > { %3109 = vmatpush1.bf16.msra.mxu0 %v4920_v30  ;;  %3215 = vmatpush1.bf16.msra.mxu1 %v4923_v31  ;;  %v2380_v30 = vrot.slane %v2375_v29, %v589_v51  ;;  %v2388_v31 = vrot.slane %v2375_v29, %v597_v52 }
 0x26c   : > { %3110 = vmatprep.subr.bf16.mxu0 %v4928_v32  ;;  %3216 = vmatprep.subr.bf16.mxu1 %v4931_v33  ;;  %v2384_v32 = vrot.slane %v2375_v29, %v593_v54  ;;  %v2392_v33 = vrot.slane %v2375_v29, %v601_v55 }
 0x26f   : > { %3111 = vmatpush1.bf16.msra.mxu0 %v4926_v34  ;;  %3217 = vmatpush1.bf16.msra.mxu1 %v4929_v35 }
 0x270   : > { %3112 = vmatprep.subr.bf16.mxu0 %v4934_v36  ;;  %3218 = vmatprep.subr.bf16.mxu1 %v4937_v37 }
 0x273   : > { %3113 = vmatpush1.bf16.msra.mxu0 %v4932_v38  ;;  %3219 = vmatpush1.bf16.msra.mxu1 %v4935_v39 }
 0x274   : > { %3114 = vmatprep.subr.bf16.mxu0 %v4940_v40  ;;  %3220 = vmatprep.subr.bf16.mxu1 %v4943_v41 }
 0x277   : > { %3115 = vmatpush1.bf16.msra.mxu0 %v4938_v42  ;;  %3221 = vmatpush1.bf16.msra.mxu1 %v4941_v43 }
 0x278   : > { %3116 = vmatprep.subr.bf16.mxu0 %v4946_v44  ;;  %3222 = vmatprep.subr.bf16.mxu1 %v4949_v45 }
 0x27b   : > { %3117 = vmatpush1.bf16.msra.mxu0 %v4944_v46  ;;  %3223 = vmatpush1.bf16.msra.mxu1 %v4947_v47 }
 0x27c   : > { %3118 = vmatprep.subr.bf16.mxu0 %v4952_v48  ;;  %3224 = vmatprep.subr.bf16.mxu1 %v4955_v49 }
 0x27f   : > { %3119 = vmatpush1.bf16.msra.mxu0 %v4950_v53  ;;  %3225 = vmatpush1.bf16.msra.mxu1 %v4953_v60 }
 0x280   : > { %3120 = vmatprep.subr.bf16.mxu0 %v4958_v56  ;;  %3226 = vmatprep.subr.bf16.mxu1 %v4961_v57 }
 0x283   : > { %3121 = vmatpush1.bf16.msra.mxu0 %v4956_v61  ;;  %3227 = vmatpush1.bf16.msra.mxu1 %v4959_v62 }
 0x284   : > { %4173 = vmatprep.subr.bf16.mxu0 %v4962_v63  ;;  %4201 = vmatprep.subr.bf16.mxu1 %v4963_v58 }
 0x286   : > { %3123 = vmatmul.mubr.bf16.vlgmr.msra.gmra.mrb[8].mxu0 %v5480_v21  ;;  %3229 = vmatmul.mubr.bf16.vlgmr.msra.gmra.mrb[8].mxu1 %v5480_v21  ;;  %v4975_v21 = vld [vmem:[#allocation8 + $0xd8] sm:$0xff]  }
 0x287   : > { %3132 = vmatprep.mubr.bf16.mxu0 %v5484_v59  ;;  %3238 = vmatprep.mubr.bf16.mxu1 %v5484_v59  ;;  %v4976_v59 = vld [vmem:[#allocation8 + $0x18] sm:$0xff]  }
 0x288   : > { %4174 = vmatpush3.bf16.msra.mxu0 %v4964_v1  ;;  %4202 = vmatpush3.bf16.msra.mxu1 %v4965_v2 }
 0x289   : > { %4175 = vmatprep.subr.bf16.mxu0 %v4966_v3  ;;  %4203 = vmatprep.subr.bf16.mxu1 %v4967_v4 }
 0x28c   : > { %4176 = vmatpush3.bf16.msra.mxu0 %v4968_v5  ;;  %4204 = vmatpush3.bf16.msra.mxu1 %v4969_v6 }
 0x28d   : > { %4177 = vmatprep.subr.bf16.mxu0 %v4970_v7  ;;  %4205 = vmatprep.subr.bf16.mxu1 %v4971_v8 }
 0x28e   : > { %3133 = vmatmul.mubr.bf16.gmra.mrb[12].mxu0 %v5482_v0  ;;  %3239 = vmatmul.mubr.bf16.gmra.mrb[12].mxu1 %v5482_v0  ;;  %v4984_v0 = vld [vmem:[#allocation8 + $0x28] sm:$0xff]  }
 0x290   : > { %4178 = vmatpush3.bf16.msra.mxu0 %v4972_v9  ;;  %4206 = vmatpush3.bf16.msra.mxu1 %v4973_v10 }
 0x291   : > { %4179 = vmatprep.subr.bf16.mxu0 %v4974_v11  ;;  %4207 = vmatprep.subr.bf16.mxu1 %v4975_v21 }
 0x294   : > { %4180 = vmatpush3.bf16.msra.mxu0 %v4976_v59  ;;  %4208 = vmatpush3.bf16.msra.mxu1 %v4977_v12 }
 0x295   : > { %4181 = vmatprep.subr.bf16.mxu0 %v4978_v13  ;;  %4209 = vmatprep.subr.bf16.mxu1 %v4979_v14 }
 0x298   : > { %4182 = vmatpush3.bf16.msra.mxu0 %v4980_v15  ;;  %4210 = vmatpush3.bf16.msra.mxu1 %v4981_v16 }
 0x299   : > { %4183 = vmatprep.subr.bf16.mxu0 %v4982_v17  ;;  %4211 = vmatprep.subr.bf16.mxu1 %v4983_v18 }
 0x29c   : > { %4184 = vmatpush3.bf16.msra.mxu0 %v4984_v0  ;;  %4212 = vmatpush3.bf16.msra.mxu1 %v4985_v19 }
 0x29d   : > { %4185 = vmatprep.subr.bf16.mxu0 %v4986_v20  ;;  %4213 = vmatprep.subr.bf16.mxu1 %v4987_v22 }
 0x2a0   : > { %4186 = vmatpush3.bf16.msra.mxu0 %v4988_v23  ;;  %4214 = vmatpush3.bf16.msra.mxu1 %v4989_v24 }
 0x2a1   : > { %4187 = vmatprep.subr.bf16.mxu0 %v4990_v25  ;;  %4215 = vmatprep.subr.bf16.mxu1 %v4991_v26 }
 0x2a4   : > { %4188 = vmatpush3.bf16.msra.mxu0 %v4992_v27  ;;  %4216 = vmatpush3.bf16.msra.mxu1 %v4993_v28  ;;  %v4134_v28 = vld [vmem:[%s5563_s6] ss:$0 sm:$0xff] }
 0x359   : > { %v3124_v34 = vpop.f32.mrb[8].mxu0  ;;  %v3230_v35 = vpop.f32.mrb[8].mxu1 }
 0x35a   : > { %v4245_v36 = vadd.f32 %v3124_v34, %v2380_v30  ;;  %v4253_v37 = vadd.f32 %v3230_v35, %v2388_v31  ;;  %v3126_v38 = vpop.f32.mrb[9].mxu0  ;;  %v3232_v39 = vpop.f32.mrb[9].mxu1 }
 0x35b   : > { %v4246_v40 = vadd.f32 %v3126_v38, %v2384_v32  ;;  %v4254_v41 = vadd.f32 %v3232_v39, %v2392_v33  ;;  %v3128_v42 = vpop.f32.mrb[10].mxu0  ;;  %v3234_v43 = vpop.f32.mrb[10].mxu1 }
 0x35c   : > { %v4247_v51 = vadd.f32 %v3128_v42, %v2380_v30  ;;  %v4255_v44 = vadd.f32 %v3234_v43, %v2388_v31  ;;  %v3130_v45 = vpop.f32.mrb[11].mxu0  ;;  %v3236_v52 = vpop.f32.mrb[11].mxu1  ;;  %v3249_v54 = vmax.f32 %v4245_v36, 0.0  ;;  %v3251_v48 = vmax.f32 %v4253_v37, 0.0 }
 0x35d   : > { %v4248_v46 = vadd.f32 %v3130_v45, %v2384_v32  ;;  %v4256_v47 = vadd.f32 %v3236_v52, %v2392_v33  ;;  %v3250_v49 = vmax.f32 %v4246_v40, 0.0  ;;  %v3252_v53 = vmax.f32 %v4254_v41, 0.0 }
 0x35e   : > { %v3253_v50 = vmax.f32 %v4247_v51, 0.0  ;;  %v3255_v55 = vmax.f32 %v4255_v44, 0.0 }
 0x35f   : > { %v3254_v60 = vmax.f32 %v4248_v46, 0.0  ;;  %v3256_v56 = vmax.f32 %v4256_v47, 0.0 }
 0x360   : > { %v3265_v57 = vpack.c.bf16 %v3253_v50, %v3249_v54  ;;  %v3267_v61 = vpack.c.bf16 %v3255_v55, %v3251_v48 }
 0x361   : > { %v3266_v62 = vpack.c.bf16 %v3254_v60, %v3250_v49  ;;  %v3268_v63 = vpack.c.bf16 %v3256_v56, %v3252_v53  ;;  %v3134_v58 = vpop.f32.mrb[12].mxu0  ;;  %v3240_v1 = vpop.f32.mrb[12].mxu1 }
 0x362   : > { %v4249_v2 = vadd.f32 %v3134_v58, %v2380_v30  ;;  %v4257_v3 = vadd.f32 %v3240_v1, %v2388_v31  ;;  %v3136_v4 = vpop.f32.mrb[13].mxu0  ;;  %v3242_v5 = vpop.f32.mrb[13].mxu1 }
 0x363   : > { %v4250_v6 = vadd.f32 %v3136_v4, %v2384_v32  ;;  %v4258_v7 = vadd.f32 %v3242_v5, %v2392_v33  ;;  %v3138_v8 = vpop.f32.mrb[14].mxu0  ;;  %v3244_v9 = vpop.f32.mrb[14].mxu1  ;;  %3568 = vmatprep.mubr.bf16.mxu0 %v3266_v62  ;;  %3617 = vmatprep.mubr.bf16.mxu1 %v3268_v63 }
 0x364   : > { %v4251_v10 = vadd.f32 %v3138_v8, %v2380_v30  ;;  %v4259_v11 = vadd.f32 %v3244_v9, %v2388_v31  ;;  %v3140_v21 = vpop.f32.mrb[15].mxu0  ;;  %v3246_v59 = vpop.f32.mrb[15].mxu1  ;;  %3569 = vmatmul.mubr.bf16.vlgmr.msra.gmra.mrb[16].mxu0 %v3265_v57  ;;  %3618 = vmatmul.mubr.bf16.vlgmr.msra.gmra.mrb[16].mxu1 %v3267_v61  ;;  %v3257_v14 = vmax.f32 %v4249_v2, 0.0  ;;  %v3259_v15 = vmax.f32 %v4257_v3, 0.0 }
 0x365   : > { %v4252_v12 = vadd.f32 %v3140_v21, %v2384_v32  ;;  %v4260_v13 = vadd.f32 %v3246_v59, %v2392_v33  ;;  %v3258_v18 = vmax.f32 %v4250_v6, 0.0  ;;  %v3260_v0 = vmax.f32 %v4258_v7, 0.0 }
 0x366   : > { %v3261_v16 = vmax.f32 %v4251_v10, 0.0  ;;  %v3263_v17 = vmax.f32 %v4259_v11, 0.0 }
 0x367   : > { %v3262_v19 = vmax.f32 %v4252_v12, 0.0  ;;  %v3264_v20 = vmax.f32 %v4260_v13, 0.0 }
 0x368   : > { %v3269_v22 = vpack.c.bf16 %v3261_v16, %v3257_v14  ;;  %v3271_v23 = vpack.c.bf16 %v3263_v17, %v3259_v15 }
 0x369   : > { %v3270_v24 = vpack.c.bf16 %v3262_v19, %v3258_v18  ;;  %v3272_v25 = vpack.c.bf16 %v3264_v20, %v3260_v0 }
 0x36b   : > { %3576 = vmatprep.mubr.bf16.mxu0 %v3270_v24  ;;  %3625 = vmatprep.mubr.bf16.mxu1 %v3272_v25 }
 0x36c   : > { %3577 = vmatmul.mubr.bf16.gmra.mrb[20].mxu0 %v3269_v22  ;;  %3626 = vmatmul.mubr.bf16.gmra.mrb[20].mxu1 %v3271_v23 }
 0x437   : > { %v4189_v26 = vpop.f32.mrb[16].mxu0  ;;  %v4217_v27 = vpop.f32.mrb[16].mxu1 }
 0x438   : > { %v4190_v29 = vpop.f32.mrb[17].mxu0  ;;  %v4218_v30 = vpop.f32.mrb[17].mxu1 }
 0x439   : > { %v4191_v31 = vadd.f32 %v4190_v29, %v4189_v26  ;;  %v4219_v32 = vadd.f32 %v4218_v30, %v4217_v27  ;;  %v4192_v33 = vpop.f32.mrb[18].mxu0  ;;  %v4220_v34 = vpop.f32.mrb[18].mxu1 }
 0x43a   : > { %v4193_v35 = vpop.f32.mrb[19].mxu0  ;;  %v4221_v36 = vpop.f32.mrb[19].mxu1 }
 0x43b   : > { %v3571_v37 = vadd.f32 %v4191_v31, %v4134_v28  ;;  %v4194_v38 = vadd.f32 %v4193_v35, %v4192_v33  ;;  %v4222_v39 = vadd.f32 %v4221_v36, %v4220_v34 }
 0x43d   : > { %v3620_v40 = vadd.f32 %v4219_v32, %v3571_v37  ;;  %v3574_v41 = vadd.f32 %v4194_v38, %v4134_v28 }
 0x43f   : > { %3634 = vst [vmem:[%s341_s14] sm:$0xff] %v3620_v40  ;;  %v3623_v42 = vadd.f32 %v4222_v39, %v3574_v41  ;;  %v4195_v43 = vpop.f32.mrb[20].mxu0  ;;  %v4223_v51 = vpop.f32.mrb[20].mxu1 }
 0x440   : > { %v4196_v44 = vpop.f32.mrb[21].mxu0  ;;  %v4224_v45 = vpop.f32.mrb[21].mxu1 }
 0x441   : > { %3635 = vst [vmem:[%s341_s14 + $0x8] sm:$0xff] %v3623_v42  ;;  %v4197_v52 = vadd.f32 %v4196_v44, %v4195_v43  ;;  %v4225_v46 = vadd.f32 %v4224_v45, %v4223_v51  ;;  %v4198_v47 = vpop.f32.mrb[22].mxu0  ;;  %v4226_v54 = vpop.f32.mrb[22].mxu1 }
 0x442   : > { %v4199_v48 = vpop.f32.mrb[23].mxu0  ;;  %v4227_v50 = vpop.f32.mrb[23].mxu1 }
 0x443   : > { %v3579_v55 = vadd.f32 %v4197_v52, %v4134_v28  ;;  %v4200_v49 = vadd.f32 %v4199_v48, %v4198_v47  ;;  %v4228_v53 = vadd.f32 %v4227_v50, %v4226_v54 }
 0x445   : > { %v3628_v60 = vadd.f32 %v4225_v46, %v3579_v55  ;;  %v3582_v56 = vadd.f32 %v4200_v49, %v4134_v28 }
 0x447   : > { %3636 = vst [vmem:[%s341_s14 + $0x10] sm:$0xff] %v3628_v60  ;;  %v3631_v57 = vadd.f32 %v4228_v53, %v3582_v56 }
 0x449   : > { %3637 = vst [vmem:[%s341_s14 + $0x18] sm:$0xff] %v3631_v57 }
 0x44a   : > { %5121 = shalt.err (!%p5118_p4)
}
 0x44b   : > { %s5122_s11 = scalar_lea.hbm %s5513_s29, 512  ;;  %s5126_s16 = scalar_lea.hbm %s5564_s7, 1024 }
 0x44c   : > { %p5123_p9 = scmp.ne.s32.totalorder %s5513_s29, %s5122_s11  ;;  %p5127_p8 = scmp.lt.u32.totalorder %s5513_s29, %s5564_s7 }
 0x44d   : > { %p5128_p13 = scmp.lt.u32.totalorder %s5126_s16, %s5122_s11  ;;  %p5130_p10 = scmp.lt.u32.totalorder %s5122_s11, %s5513_s29 }
 0x44e   : > { %p5124_p0 = pnand %p5123_p9, %p5383_p5 }
 0x44f   : > { %p5129_p6 = por %p5128_p13, %p5127_p8 }
 0x450   : > { %p5125_p11 = pneg %p5124_p0 }
 0x451   : > { %p5131_p3 = por %p5130_p10, %p5129_p6 }
 0x453   : > { %p5132_p7 = pnand %p5131_p3, %p5125_p11 }
 0x455   : > { %5135 = shalt.err (!%p5132_p7)
}
 0x456   : > { %s5196_s18 = smov 128   ;;  %s5197_s23 = smov 8  }
 0x457   : > { %4342 = dma.vmem_to_hbm [thread:$0]  (%p5383_p5), %s5508_s17, 512, %s5513_s29, %s3639_s12, %s5196_s18, %s5196_s18, %s5197_s23  }
 0x458 PF: > { %s5584_s30 = sld [smem:[#allocation15_spill]]  ;;  %s3667_s28 = sand.u32 1, %s5170_s24  }
 0x459   : > { %p5586_p2 = scmp.ge.s32.totalorder %s5182_s27, 2  ;;  %s3668_s9 = scalar_lea.sflag [#allocation4], %s3667_s28 }
 0x45e   : > { %p5585_p12 = scmp.ne.s32.totalorder %s5584_s30, 0 }
 0x460   : > { %p4359_p1 = pnand %p5586_p2, %p5585_p12 }
 0x462   : > { %5165 = dma.done.wait (!%p4359_p1), %s3668_s9, 512  }
 0x463   : > { %5167 = vsyncadd (!%p4359_p1), %s3668_s9, 4294966784  ;;  %p22_p4 = scmp.ge.s32.totalorder %s5369_s8, 4   ;;  %s5587_s24 = smov %s5174_s25 }
 0x464   : > { %s5588_s25 = smov %s5178_s26  ;;  %s5589_s26 = smov %s5379_s19 }
 0x465   : > { %s5590_s27 = smov %s5369_s8  ;;  %24 = sbr.rel (!%p22_p4) target bundleno = 7 (0x7), region = 105 }
 0x46c   :  { %3673 = vsyncpa [#allocation3], 1 }
 0x46d   :  { %3675 = vsyncpa [#allocation3 + $0x1], 1 }
 0x46e   :  { %3676 = vsyncpa [#allocation6], 1 }
 0x46f   :  { %3677 = vsyncpa [#allocation9], 1 }
 0x470   :  { %3678 = vsyncpa [#allocation4], 1 }
 0x471   :  { %3680 = vsyncpa [#allocation4 + $0x1], 1 }

</bundles_post_ra>
